<compile_context>
chip_gen: v7x
topology: tpu7x:2x2x1
jax: 0.10.0
libtpu: 0.0.40
codegen_flags: <defaults>
</compile_context>

<pallas_src>
import jax
import jax.numpy as jnp
from jax.experimental import pallas as pl
from jax.experimental.pallas import tpu as pltpu


def regression_head_kernel(x_ref, w_ref, b_ref, o_ref, acc_ref):
    # x_ref: (TN, TC, HW)   lanes = spatial, sublanes = channels
    # w_ref: (TC, O) f32, pre-scaled by 1/(H*W);  b_ref: (1, O) f32
    # o_ref: (TN, O);       acc_ref: (TN, O) f32 scratch, resident across C axis
    j = pl.program_id(1)

    @pl.when(j == 0)
    def _():
        acc_ref[...] = jnp.zeros_like(acc_ref)

    # Global average pooling == spatial sum (the 1/(H*W) scale lives in w).
    # f32 accumulation happens inside the reduction (no full f32 tile temp).
    pooled = jnp.sum(x_ref[...], axis=-1, dtype=jnp.float32)            # (TN, TC)
    acc_ref[...] += jnp.dot(pooled, w_ref[...],
                            preferred_element_type=jnp.float32)          # (TN, O)

    @pl.when(j == pl.num_programs(1) - 1)
    def _():
        # Dropout(p=0.5) is identity in eval mode.
        o_ref[...] = (acc_ref[...] + b_ref[...]).astype(o_ref.dtype)


def _round_up(v, m):
    return ((v + m - 1) // m) * m


def _choose_tiles(n, c, hw, itemsize, budget_bytes):
    """Pick (tile_n, tile_c) so each x block stays under budget.

    tile_c always divides C exactly (no ragged reduction blocks can contaminate
    the matmul).  tile_n is a multiple of 8 (or == n when n < 8); a ragged last
    batch block is handled by Pallas' masked output store.
    """
    hw_pad = _round_up(hw, 128)          # lane padding of the spatial axis in VMEM
    per_elem = hw_pad * itemsize
    row_min = n if n < 8 else 8

    def block_bytes(tn, tc):
        return tn * tc * per_elem

    # Channel (reduction) tile: biggest multiple-of-8 divisor of C whose minimal
    # batch block fits the budget.  Fall back to full C when C % 8 != 0.
    tile_c = c
    if c % 8 == 0 and block_bytes(row_min, c) > budget_bytes:
        chosen = None
        for cand in range(c, 7, -8):
            if c % cand == 0 and block_bytes(row_min, cand) <= budget_bytes:
                chosen = cand
                break
        if chosen is None:
            chosen = next((d for d in range(8, c + 1, 8) if c % d == 0), c)
        tile_c = chosen

    # Batch (parallel) tile: as many rows as fit the budget.
    if n <= 8:
        tile_n = n
    else:
        tile_n = max(8, (int(budget_bytes // (tile_c * per_elem)) // 8) * 8)
        tile_n = min(tile_n, max(8, (n // 8) * 8))
        if n >= 16:
            # Keep >= 2 batch grid steps so both v7x TensorCores get work.
            half = max(8, (pl.cdiv(n, 2) // 8) * 8)
            tile_n = min(tile_n, half)
    return tile_n, tile_c


def regression_head(x_nchw, weight, bias, *, budget_bytes=12 << 20):
    """x_nchw: (N, C, H, W); weight: (O, C); bias: (O,) -> (N, O)."""
    N, C, H, W = x_nchw.shape
    O = weight.shape[0]
    HW = H * W

    # Copy-free contiguous view of NCHW: no wrapper transpose, no extra HBM pass.
    x = x_nchw.reshape(N, C, HW)
    # Fold the average-pool scale into the weights AFTER the f32 cast so bf16
    # weights are not re-quantized.
    w_scaled = weight.astype(jnp.float32).T * (1.0 / HW)                  # (C, O)
    b = bias.astype(jnp.float32).reshape(1, O)

    itemsize = jnp.dtype(x.dtype).itemsize
    tile_n, tile_c = _choose_tiles(N, C, HW, itemsize, budget_bytes)
    grid = (pl.cdiv(N, tile_n), C // tile_c)

    cost = pl.CostEstimate(
        flops=2 * N * C * O + N * HW * C,
        transcendentals=0,
        bytes_accessed=N * C * HW * itemsize + C * O * 4 + O * 4
                       + N * O * jnp.dtype(x_nchw.dtype).itemsize,
    )

    out = pl.pallas_call(
        regression_head_kernel,
        out_shape=jax.ShapeDtypeStruct((N, O), x_nchw.dtype),
        grid_spec=pltpu.PrefetchScalarGridSpec(
            num_scalar_prefetch=0,
            grid=grid,
            in_specs=[
                pl.BlockSpec((tile_n, tile_c, HW), lambda i, j: (i, j, 0)),
                pl.BlockSpec((tile_c, O), lambda i, j: (j, 0)),
                pl.BlockSpec((1, O), lambda i, j: (0, 0)),
            ],
            out_specs=pl.BlockSpec((tile_n, O), lambda i, j: (i, 0)),
            scratch_shapes=[pltpu.VMEM((tile_n, O), jnp.float32)],
        ),
        compiler_params=pltpu.CompilerParams(
            # Batch tiles independent (megacore-shardable on v7x); channel axis
            # is the reduction -> "arbitrary", placed last.
            dimension_semantics=("parallel", "arbitrary"),
            vmem_limit_bytes=48 << 20,
        ),
        cost_estimate=cost,
    )(x, w_scaled, b)

    return out


if __name__ == "__main__":
    # resnet18.fc.in_features == 512; small synthetic batch/spatial shapes.
    N, C, H, W = 2, 512, 8, 8
    num_outputs = 4

    key = jax.random.PRNGKey(0)
    kx, kw, kb = jax.random.split(key, 3)
    x = jax.random.normal(kx, (N, C, H, W), dtype=jnp.float32)
    # Deterministic init mimicking nn.Linear default (uniform in +/- 1/sqrt(C)).
    bound = 1.0 / jnp.sqrt(jnp.float32(C))
    weight = jax.random.uniform(kw, (num_outputs, C), minval=-bound, maxval=bound,
                                dtype=jnp.float32)
    bias = jax.random.uniform(kb, (num_outputs,), minval=-bound, maxval=bound,
                              dtype=jnp.float32)

    out = regression_head(x, weight, bias)
    out = jax.block_until_ready(out)

    # Pure-JAX reference (eval-mode dropout == identity).
    pooled_ref = jnp.mean(x, axis=(2, 3))                                 # (N, C)
    ref = pooled_ref @ weight.T + bias                                    # (N, O)
    assert out.shape == (N, num_outputs)
    assert jnp.allclose(out, ref, atol=1e-4, rtol=1e-4), "mismatch vs reference"

    print("KERNEL_OK")
</pallas_src>

<mosaic_0001>
module attributes {stable_mosaic.version = 11 : i64} {
  func.func @regression_head_kernel(%arg0: i32, %arg1: i32, %arg2: memref<2x512x64xf32, #tpu.memory_space<vmem>>, %arg3: memref<512x4xf32, #tpu.memory_space<vmem>>, %arg4: memref<1x4xf32, #tpu.memory_space<vmem>>, %arg5: memref<2x4xf32, #tpu.memory_space<vmem>>, %arg6: memref<2x4xf32, #tpu.memory_space<vmem>>) attributes {dimension_semantics = [#tpu.dimension_semantics<parallel>, #tpu.dimension_semantics<arbitrary>], iteration_bounds = array<i64: 1, 1>, scalar_prefetch = 0 : i64, scratch_operands = 1 : i64, tpu.core_type = #tpu.core_type<tc>, window_params = [{transform_indices = @transform_0, window_bounds = array<i64: 2, 512, 64>}, {transform_indices = @transform_1, window_bounds = array<i64: 512, 4>}, {pipeline_mode = #tpu.pipeline_mode<synchronous>, transform_indices = @transform_2, window_bounds = array<i64: 1, 4>}, {transform_indices = @transform_3, window_bounds = array<i64: 2, 4>}]} {
    %c0_i32 = arith.constant 0 : i32
    %0 = arith.cmpi eq, %arg1, %c0_i32 : i32
    %1 = arith.extui %0 : i1 to i32
    %c0_i32_0 = arith.constant 0 : i32
    %2 = arith.cmpi ne, %1, %c0_i32_0 : i32
    scf.if %2 {
      %cst_12 = arith.constant 0.000000e+00 : f32
      %13 = vector.broadcast %cst_12 : f32 to vector<2x4xf32>
      %c0_13 = arith.constant 0 : index
      %c0_14 = arith.constant 0 : index
      %14 = vector.load %arg6[%c0_13, %c0_14] : memref<2x4xf32, #tpu.memory_space<vmem>>, vector<2x4xf32>
      tpu.vector_store %arg6[%c0_13, %c0_14], %13 {strides = array<i32>} : memref<2x4xf32, #tpu.memory_space<vmem>>, vector<2x4xf32>,
    } else {
    }
    %c0 = arith.constant 0 : index
    %c0_1 = arith.constant 0 : index
    %c0_2 = arith.constant 0 : index
    %3 = vector.load %arg2[%c0, %c0_1, %c0_2] : memref<2x512x64xf32, #tpu.memory_space<vmem>>, vector<2x512x64xf32>
    %cst = arith.constant dense<0.000000e+00> : vector<2x512xf32>
    %4 = vector.multi_reduction <add>, %3, %cst [2] : vector<2x512x64xf32> to vector<2x512xf32>
    %c0_3 = arith.constant 0 : index
    %c0_4 = arith.constant 0 : index
    %5 = vector.load %arg6[%c0_3, %c0_4] : memref<2x4xf32, #tpu.memory_space<vmem>>, vector<2x4xf32>
    %c0_5 = arith.constant 0 : index
    %c0_6 = arith.constant 0 : index
    %6 = vector.load %arg3[%c0_5, %c0_6] : memref<512x4xf32, #tpu.memory_space<vmem>>, vector<512x4xf32>
    %cst_7 = arith.constant dense<0.000000e+00> : vector<2x4xf32>
    %7 = tpu.matmul %4, %6, %cst_7 {dimension_numbers = #tpu.dot_dimension_numbers<[1], [0], [0], [1], [0, 0, 1, 1], [], []>} : vector<2x512xf32>, vector<512x4xf32>, vector<2x4xf32> -> vector<2x4xf32>
    %8 = arith.addf %5, %7 : vector<2x4xf32>
    %c0_8 = arith.constant 0 : index
    %c0_9 = arith.constant 0 : index
    %9 = vector.load %arg6[%c0_8, %c0_9] : memref<2x4xf32, #tpu.memory_space<vmem>>, vector<2x4xf32>
    tpu.vector_store %arg6[%c0_8, %c0_9], %8 {strides = array<i32>} : memref<2x4xf32, #tpu.memory_space<vmem>>, vector<2x4xf32>,
    %c0_i32_10 = arith.constant 0 : i32
    %10 = arith.cmpi eq, %arg1, %c0_i32_10 : i32
    %11 = arith.extui %10 : i1 to i32
    %c0_i32_11 = arith.constant 0 : i32
    %12 = arith.cmpi ne, %11, %c0_i32_11 : i32
    scf.if %12 {
      %c0_12 = arith.constant 0 : index
      %c0_13 = arith.constant 0 : index
      %13 = vector.load %arg6[%c0_12, %c0_13] : memref<2x4xf32, #tpu.memory_space<vmem>>, vector<2x4xf32>
      %c0_14 = arith.constant 0 : index
      %c0_15 = arith.constant 0 : index
      %14 = vector.load %arg4[%c0_14, %c0_15] : memref<1x4xf32, #tpu.memory_space<vmem>>, vector<1x4xf32>
      %15 = vector.broadcast %14 : vector<1x4xf32> to vector<2x4xf32>
      %16 = arith.addf %13, %15 : vector<2x4xf32>
      %c0_16 = arith.constant 0 : index
      %c0_17 = arith.constant 0 : index
      %17 = vector.load %arg5[%c0_16, %c0_17] : memref<2x4xf32, #tpu.memory_space<vmem>>, vector<2x4xf32>
      tpu.vector_store %arg5[%c0_16, %c0_17], %16 {strides = array<i32>} : memref<2x4xf32, #tpu.memory_space<vmem>>, vector<2x4xf32>,
    } else {
    }
    return
  }
  func.func @transform_0(%arg0: i32, %arg1: i32) -> (i32, i32, i32) {
    %c0_i32 = arith.constant 0 : i32
    %c0_i32_0 = arith.constant 0 : i32
    return %arg0, %arg1, %c0_i32 : i32, i32, i32
  }
  func.func @transform_1(%arg0: i32, %arg1: i32) -> (i32, i32) {
    %c0_i32 = arith.constant 0 : i32
    %c0_i32_0 = arith.constant 0 : i32
    return %arg1, %c0_i32 : i32, i32
  }
  func.func @transform_2(%arg0: i32, %arg1: i32) -> (i32, i32) {
    %c0_i32 = arith.constant 0 : i32
    %c0_i32_0 = arith.constant 0 : i32
    %c0_i32_1 = arith.constant 0 : i32
    return %c0_i32, %c0_i32_0 : i32, i32
  }
  func.func @transform_3(%arg0: i32, %arg1: i32) -> (i32, i32) {
    %c0_i32 = arith.constant 0 : i32
    %c0_i32_0 = arith.constant 0 : i32
    return %arg0, %c0_i32 : i32, i32
  }
}

</mosaic_0001>

<bundles_post_ra>
// kernel: tpu_custom_call.1
= control target key start
LH: loop header
LB: loop body
LE: loop exit
PB: predicated region body
PF: predicated region fallthrough
CT: control target
= control target key end

     0   :  { %vm149_vm0 = vcmask 523264   ;;  %s2928_s0 = inlined_call_operand.vmem [shape: f32[2,512,64], index: 0, kind: input, shape index: {}]   ;;  %s2929_s1 = inlined_call_operand.vmem [shape: f32[512,4], index: 1, kind: input, shape index: {}]   ;;  %s2930_s2 = inlined_call_operand.vmem [shape: f32[1,4], index: 2, kind: input, shape index: {}]   ;;  %s2931_s3 = inlined_call_operand.hbm [shape: f32[2,4], index: 3, kind: output, shape index: {}]  }
   0x1   :  { %v69_v0 = vld [vmem:[%s2928_s0 + $0x180] sm:$0xff]  ;;  %v70_v2 = vld [vmem:[%s2928_s0 + $0x188] sm:$0xff]  ;;  %v39_v21 = vld [vmem:[%s2928_s0 + $0x90] sm:$0xff] }
   0x2   :  { %v37_v1 = vld [vmem:[%s2928_s0 + $0x80] sm:$0xff]  ;;  %v294_v3 = vsel %vm149_vm0, %v69_v0, 0.0  ;;  %v38_v5 = vld [vmem:[%s2928_s0 + $0x88] sm:$0xff]  ;;  %v297_v6 = vsel %vm149_vm0, %v70_v2, 0.0  ;;  %v204_v23 = vsel %vm149_vm0, %v39_v21, 0.0  ;;  %v71_v24 = vld [vmem:[%s2928_s0 + $0x190] sm:$0xff] }
   0x3   :  { %v198_v4 = vsel %vm149_vm0, %v37_v1, 0.0  ;;  %295 = vadd.xlane.f32.xlu1 %v294_v3  ;;  %v201_v7 = vsel %vm149_vm0, %v38_v5, 0.0  ;;  %v102_v8 = vld [vmem:[%s2928_s0 + $0x288] sm:$0xff]  ;;  %v101_v9 = vld [vmem:[%s2928_s0 + $0x280] sm:$0xff]  ;;  %v300_v26 = vsel %vm149_vm0, %v71_v24, 0.0 }
   0x4   :  { %199 = vadd.xlane.f32.xlu0 %v198_v4  ;;  %v393_v10 = vsel %vm149_vm0, %v102_v8, 0.0  ;;  %v390_v11 = vsel %vm149_vm0, %v101_v9, 0.0  ;;  %v134_v12 = vld [vmem:[%s2928_s0 + $0x388] sm:$0xff]  ;;  %v133_v13 = vld [vmem:[%s2928_s0 + $0x380] sm:$0xff] }
   0x5   :  { %v489_v14 = vsel %vm149_vm0, %v134_v12, 0.0  ;;  %v486_v15 = vsel %vm149_vm0, %v133_v13, 0.0  ;;  %v22_v16 = vld [vmem:[%s2928_s0 + $0x8] sm:$0xff]  ;;  %v21_v17 = vld [vmem:[%s2928_s0] sm:$0xff] }
   0x6   :  { %v153_v18 = vsel %vm149_vm0, %v22_v16, 0.0  ;;  %v150_v19 = vsel %vm149_vm0, %v21_v17, 0.0  ;;  %v53_v20 = vld [vmem:[%s2928_s0 + $0x100] sm:$0xff]  ;;  %v54_v25 = vld [vmem:[%s2928_s0 + $0x108] sm:$0xff] }
   0x7   :  { %298 = vadd.xlane.f32.xlu1 %v297_v6  ;;  %v246_v22 = vsel %vm149_vm0, %v53_v20, 0.0  ;;  %v249_v27 = vsel %vm149_vm0, %v54_v25, 0.0  ;;  %v86_v28 = vld [vmem:[%s2928_s0 + $0x208] sm:$0xff]  ;;  %v85_v29 = vld [vmem:[%s2928_s0 + $0x200] sm:$0xff] }
   0x8   :  { %202 = vadd.xlane.f32.xlu0 %v201_v7  ;;  %v345_v30 = vsel %vm149_vm0, %v86_v28, 0.0  ;;  %v342_v31 = vsel %vm149_vm0, %v85_v29, 0.0 }
   0xb   :  { %394 = vadd.xlane.f32.xlu1 %v393_v10 }
   0xc   :  { %391 = vadd.xlane.f32.xlu0 %v390_v11 }
   0xf   :  { %490 = vadd.xlane.f32.xlu1 %v489_v14 }
  0x10   :  { %487 = vadd.xlane.f32.xlu0 %v486_v15 }
  0x13   :  { %154 = vadd.xlane.f32.xlu1 %v153_v18 }
  0x14   :  { %151 = vadd.xlane.f32.xlu0 %v150_v19 }
  0x17   :  { %247 = vadd.xlane.f32.xlu1 %v246_v22 }
  0x18   :  { %205 = vadd.xlane.f32.xlu0 %v204_v23 }
  0x1b   :  { %301 = vadd.xlane.f32.xlu1 %v300_v26 }
  0x1c   :  { %250 = vadd.xlane.f32.xlu0 %v249_v27 }
  0x1d   :  { %8 = vsyncpa [#allocation4], 0  ;;  %v117_v32 = vld [vmem:[%s2928_s0 + $0x300] sm:$0xff]  ;;  %v103_v33 = vld [vmem:[%s2928_s0 + $0x290] sm:$0xff]  ;;  %vm738_vm1 = vcmask 130112   ;;  %vm745_vm2 = vcmask 195712  }
  0x1e   :  { %v438_v34 = vsel %vm149_vm0, %v117_v32, 0.0  ;;  %v396_v35 = vsel %vm149_vm0, %v103_v33, 0.0  ;;  %v135_v36 = vld [vmem:[%s2928_s0 + $0x390] sm:$0xff]  ;;  %v118_v37 = vld [vmem:[%s2928_s0 + $0x308] sm:$0xff]  ;;  %v40_v40 = vld [vmem:[%s2928_s0 + $0x98] sm:$0xff]  ;;  %vm752_vm3 = vcmask 261312  }
  0x1f   :  { %346 = vadd.xlane.f32.xlu1 %v345_v30  ;;  %v492_v38 = vsel %vm149_vm0, %v135_v36, 0.0  ;;  %v441_v39 = vsel %vm149_vm0, %v118_v37, 0.0  ;;  %v23_v41 = vld [vmem:[%s2928_s0 + $0x10] sm:$0xff]  ;;  %v207_v42 = vsel %vm149_vm0, %v40_v40, 0.0  ;;  %v72_v44 = vld [vmem:[%s2928_s0 + $0x198] sm:$0xff]  ;;  %v41_v56 = vld [vmem:[%s2928_s0 + $0xa0] sm:$0xff] }
  0x20   :  { %343 = vadd.xlane.f32.xlu0 %v342_v31  ;;  %v156_v43 = vsel %vm149_vm0, %v23_v41, 0.0  ;;  %v55_v45 = vld [vmem:[%s2928_s0 + $0x110] sm:$0xff]  ;;  %v303_v46 = vsel %vm149_vm0, %v72_v44, 0.0  ;;  %v104_v48 = vld [vmem:[%s2928_s0 + $0x298] sm:$0xff]  ;;  %v210_v58 = vsel %vm149_vm0, %v41_v56, 0.0  ;;  %v73_v60 = vld [vmem:[%s2928_s0 + $0x1a0] sm:$0xff] }
  0x21   :  { %v252_v47 = vsel %vm149_vm0, %v55_v45, 0.0  ;;  %v87_v49 = vld [vmem:[%s2928_s0 + $0x210] sm:$0xff]  ;;  %v399_v50 = vsel %vm149_vm0, %v104_v48, 0.0  ;;  %v136_v52 = vld [vmem:[%s2928_s0 + $0x398] sm:$0xff]  ;;  %v306_v62 = vsel %vm149_vm0, %v73_v60, 0.0  ;;  %v105_v0 = vld [vmem:[%s2928_s0 + $0x2a0] sm:$0xff] }
  0x22   :  { %v348_v51 = vsel %vm149_vm0, %v87_v49, 0.0  ;;  %v119_v53 = vld [vmem:[%s2928_s0 + $0x310] sm:$0xff]  ;;  %v495_v54 = vsel %vm149_vm0, %v136_v52, 0.0  ;;  %v24_v57 = vld [vmem:[%s2928_s0 + $0x18] sm:$0xff]  ;;  %v402_v2 = vsel %vm149_vm0, %v105_v0, 0.0  ;;  %v137_v4 = vld [vmem:[%s2928_s0 + $0x3a0] sm:$0xff] }
  0x23   :  { %439 = vadd.xlane.f32.xlu1 %v438_v34  ;;  %v444_v55 = vsel %vm149_vm0, %v119_v53, 0.0  ;;  %v159_v59 = vsel %vm149_vm0, %v24_v57, 0.0  ;;  %v56_v61 = vld [vmem:[%s2928_s0 + $0x118] sm:$0xff]  ;;  %v498_v6 = vsel %vm149_vm0, %v137_v4, 0.0  ;;  %v42_v8 = vld [vmem:[%s2928_s0 + $0xa8] sm:$0xff]  ;;  %v25_v9 = vld [vmem:[%s2928_s0 + $0x20] sm:$0xff] }
  0x24   :  { %397 = vadd.xlane.f32.xlu0 %v396_v35  ;;  %v255_v63 = vsel %vm149_vm0, %v56_v61, 0.0  ;;  %v88_v1 = vld [vmem:[%s2928_s0 + $0x218] sm:$0xff]  ;;  %v213_v10 = vsel %vm149_vm0, %v42_v8, 0.0  ;;  %v162_v11 = vsel %vm149_vm0, %v25_v9, 0.0  ;;  %v74_v12 = vld [vmem:[%s2928_s0 + $0x1a8] sm:$0xff]  ;;  %v57_v13 = vld [vmem:[%s2928_s0 + $0x120] sm:$0xff] }
  0x25   :  { %v351_v3 = vsel %vm149_vm0, %v88_v1, 0.0  ;;  %v120_v5 = vld [vmem:[%s2928_s0 + $0x318] sm:$0xff]  ;;  %v309_v14 = vsel %vm149_vm0, %v74_v12, 0.0  ;;  %v258_v15 = vsel %vm149_vm0, %v57_v13, 0.0  ;;  %v106_v16 = vld [vmem:[%s2928_s0 + $0x2a8] sm:$0xff]  ;;  %v89_v17 = vld [vmem:[%s2928_s0 + $0x220] sm:$0xff] }
  0x26   :  { %v447_v7 = vsel %vm149_vm0, %v120_v5, 0.0  ;;  %v405_v18 = vsel %vm149_vm0, %v106_v16, 0.0  ;;  %v354_v19 = vsel %vm149_vm0, %v89_v17, 0.0  ;;  %v138_v20 = vld [vmem:[%s2928_s0 + $0x3a8] sm:$0xff]  ;;  %v121_v21 = vld [vmem:[%s2928_s0 + $0x320] sm:$0xff]  ;;  %v43_v24 = vld [vmem:[%s2928_s0 + $0xb0] sm:$0xff] }
  0x27   :  { %493 = vadd.xlane.f32.xlu1 %v492_v38  ;;  %v501_v22 = vsel %vm149_vm0, %v138_v20, 0.0  ;;  %v450_v23 = vsel %vm149_vm0, %v121_v21, 0.0  ;;  %v26_v25 = vld [vmem:[%s2928_s0 + $0x28] sm:$0xff]  ;;  %v216_v26 = vsel %vm149_vm0, %v43_v24, 0.0  ;;  %v75_v28 = vld [vmem:[%s2928_s0 + $0x1b0] sm:$0xff]  ;;  %v44_v40 = vld [vmem:[%s2928_s0 + $0xb8] sm:$0xff] }
  0x28   :  { %442 = vadd.xlane.f32.xlu0 %v441_v39  ;;  %v165_v27 = vsel %vm149_vm0, %v26_v25, 0.0  ;;  %v58_v29 = vld [vmem:[%s2928_s0 + $0x128] sm:$0xff]  ;;  %v312_v30 = vsel %vm149_vm0, %v75_v28, 0.0  ;;  %v107_v32 = vld [vmem:[%s2928_s0 + $0x2b0] sm:$0xff]  ;;  %v76_v44 = vld [vmem:[%s2928_s0 + $0x1b8] sm:$0xff]  ;;  %vm759_vm4 = vcmask 326912  }
  0x29   :  { %v261_v31 = vsel %vm149_vm0, %v58_v29, 0.0  ;;  %v90_v33 = vld [vmem:[%s2928_s0 + $0x228] sm:$0xff]  ;;  %v408_v34 = vsel %vm149_vm0, %v107_v32, 0.0  ;;  %v139_v36 = vld [vmem:[%s2928_s0 + $0x3b0] sm:$0xff]  ;;  %v108_v48 = vld [vmem:[%s2928_s0 + $0x2b8] sm:$0xff]  ;;  %vm766_vm5 = vcmask 392512  }
  0x2a   :  { %v357_v35 = vsel %vm149_vm0, %v90_v33, 0.0  ;;  %v122_v37 = vld [vmem:[%s2928_s0 + $0x328] sm:$0xff]  ;;  %v504_v38 = vsel %vm149_vm0, %v139_v36, 0.0  ;;  %v27_v41 = vld [vmem:[%s2928_s0 + $0x30] sm:$0xff]  ;;  %v140_v52 = vld [vmem:[%s2928_s0 + $0x3b8] sm:$0xff]  ;;  %vm773_vm6 = vcmask 458112  }
  0x2b   :  { %208 = vadd.xlane.f32.xlu1 %v207_v42  ;;  %v453_v39 = vsel %vm149_vm0, %v122_v37, 0.0  ;;  %v219_v42 = vsel %vm149_vm0, %v44_v40, 0.0  ;;  %v59_v45 = vld [vmem:[%s2928_s0 + $0x130] sm:$0xff]  ;;  %v45_v56 = vld [vmem:[%s2928_s0 + $0xc0] sm:$0xff]  ;;  %v28_v57 = vld [vmem:[%s2928_s0 + $0x38] sm:$0xff]  ;;  %vm780_vm7 = vcmask 523712  }
  0x2c   :  { %157 = vadd.xlane.f32.xlu0 %v156_v43  ;;  %v168_v43 = vsel %vm149_vm0, %v27_v41, 0.0  ;;  %v91_v49 = vld [vmem:[%s2928_s0 + $0x230] sm:$0xff]  ;;  %v77_v60 = vld [vmem:[%s2928_s0 + $0x1c0] sm:$0xff]  ;;  %v60_v61 = vld [vmem:[%s2928_s0 + $0x138] sm:$0xff]  ;;  %vm787_vm8 = vcmask 589312   ;;  %vm794_vm9 = vcmask 654912  }
  0x2d   :  { %v123_v53 = vld [vmem:[%s2928_s0 + $0x330] sm:$0xff]  ;;  %v109_v0 = vld [vmem:[%s2928_s0 + $0x2c0] sm:$0xff]  ;;  %v92_v1 = vld [vmem:[%s2928_s0 + $0x238] sm:$0xff]  ;;  %vm801_vm10 = vcmask 720512   ;;  %vm808_vm11 = vcmask 786112   ;;  %vm815_vm12 = vcmask 851712  }
  0x2e   :  { %v141_v4 = vld [vmem:[%s2928_s0 + $0x3c0] sm:$0xff]  ;;  %v124_v5 = vld [vmem:[%s2928_s0 + $0x338] sm:$0xff]  ;;  %v46_v8 = vld [vmem:[%s2928_s0 + $0xc8] sm:$0xff]  ;;  %vm822_vm13 = vcmask 917312   ;;  %vm829_vm14 = vcmask 982912   ;;  %vm836_vm15 = vcmask 1048512  }
  0x2f   :  { %304 = vadd.xlane.f32.xlu1 %v303_v46  ;;  %v315_v46 = vsel %vm149_vm0, %v76_v44, 0.0  ;;  %v29_v9 = vld [vmem:[%s2928_s0 + $0x40] sm:$0xff]  ;;  %v78_v13 = vld [vmem:[%s2928_s0 + $0x1c8] sm:$0xff]  ;;  %s1732_s16 = smov [#allocation3]  }
  0x30   :  { %253 = vadd.xlane.f32.xlu0 %v252_v47  ;;  %v264_v47 = vsel %vm149_vm0, %v59_v45, 0.0  ;;  %v174_v12 = vsel %vm149_vm0, %v29_v9, 0.0  ;;  %v321_v16 = vsel %vm149_vm0, %v78_v13, 0.0  ;;  %v93_v20 = vld [vmem:[%s2928_s0 + $0x240] sm:$0xff]  ;;  %v142_v28 = vld [vmem:[%s2928_s0 + $0x3c8] sm:$0xff]  ;;  %v31_v13 = vld [vmem:[%s2928_s0 + $0x50] sm:$0xff] }
  0x31   :  { %v366_v25 = vsel %vm149_vm0, %v93_v20, 0.0  ;;  %v125_v29 = vld [vmem:[%s2928_s0 + $0x340] sm:$0xff]  ;;  %v513_v32 = vsel %vm149_vm0, %v142_v28, 0.0  ;;  %v180_v20 = vsel %vm149_vm0, %v31_v13, 0.0  ;;  %s1562_s17 = sshll.u32 %s1732_s16, 4  ;;  %s1563_s17 = int_to_ptr.vmem [resolvable:$true] %s1562_s17 }
  0x32   :  { %v462_v33 = vsel %vm149_vm0, %v125_v29, 0.0  ;;  %s1707_s18 = scalar_lea.vmem %s1563_s17, 32  ;;  %p1712_p1 = scmp.lt.s32.totalorder %s1563_s17, %s1563_s17 }
  0x33   :  { %400 = vadd.xlane.f32.xlu1 %v399_v50  ;;  %v411_v50 = vsel %vm149_vm0, %v108_v48, 0.0  ;;  %v79_v48 = vld [vmem:[%s2928_s0 + $0x1d0] sm:$0xff]  ;;  %p1708_p0 = scmp.ne.s32.totalorder %s1563_s17, %s1707_s18  ;;  %p1713_p2 = scmp.lt.s32.totalorder %s1707_s18, %s1707_s18 }
  0x34   :  { %349 = vadd.xlane.f32.xlu0 %v348_v51  ;;  %v360_v51 = vsel %vm149_vm0, %v91_v49, 0.0  ;;  %v62_v49 = vld [vmem:[%s2928_s0 + $0x148] sm:$0xff] }
  0x35   :  { %p1714_p3 = por %p1713_p2, %p1712_p1 }
  0x37   :  { %496 = vadd.xlane.f32.xlu1 %v495_v54  ;;  %v507_v54 = vsel %vm149_vm0, %v140_v52, 0.0  ;;  %p1715_p4 = pnand %p1714_p3, %p1708_p0 }
  0x38   :  { %445 = vadd.xlane.f32.xlu0 %v444_v55  ;;  %v456_v55 = vsel %vm149_vm0, %v123_v53, 0.0  ;;  %v324_v53 = vsel %vm149_vm0, %v79_v48, 0.0 }
  0x3b   :  { %211 = vadd.xlane.f32.xlu1 %v210_v58  ;;  %v222_v58 = vsel %vm149_vm0, %v45_v56, 0.0 }
  0x3c   :  { %160 = vadd.xlane.f32.xlu0 %v159_v59  ;;  %v171_v59 = vsel %vm149_vm0, %v28_v57, 0.0  ;;  %v111_v57 = vld [vmem:[%s2928_s0 + $0x2d0] sm:$0xff] }
  0x3f   :  { %307 = vadd.xlane.f32.xlu1 %v306_v62  ;;  %v318_v62 = vsel %vm149_vm0, %v77_v60, 0.0 }
  0x40   :  { %256 = vadd.xlane.f32.xlu0 %v255_v63  ;;  %v267_v63 = vsel %vm149_vm0, %v60_v61, 0.0 }
  0x43   :  { %403 = vadd.xlane.f32.xlu1 %v402_v2  ;;  %v414_v2 = vsel %vm149_vm0, %v109_v0, 0.0 }
  0x44   :  { %352 = vadd.xlane.f32.xlu0 %v351_v3  ;;  %v363_v3 = vsel %vm149_vm0, %v92_v1, 0.0 }
  0x47   :  { %499 = vadd.xlane.f32.xlu1 %v498_v6  ;;  %v510_v6 = vsel %vm149_vm0, %v141_v4, 0.0  ;;  %v143_v4 = vld [vmem:[%s2928_s0 + $0x3d0] sm:$0xff] }
  0x48   :  { %448 = vadd.xlane.f32.xlu0 %v447_v7  ;;  %v459_v7 = vsel %vm149_vm0, %v124_v5, 0.0  ;;  %v126_v5 = vld [vmem:[%s2928_s0 + $0x348] sm:$0xff]  ;;  %v516_v9 = vsel %vm149_vm0, %v143_v4, 0.0 }
  0x4b   :  { %214 = vadd.xlane.f32.xlu1 %v213_v10  ;;  %v727_v10 = vlaneseq }
  0x4c   :  { %163 = vadd.xlane.f32.xlu0 %v162_v11  ;;  %v225_v11 = vsel %vm149_vm0, %v46_v8, 0.0 }
  0x4f   :  { %310 = vadd.xlane.f32.xlu1 %v309_v14  ;;  %v61_v14 = vld [vmem:[%s2928_s0 + $0x140] sm:$0xff] }
  0x50   :  { %259 = vadd.xlane.f32.xlu0 %v258_v15  ;;  %v2039_v15 = vand.u32 127, %v727_v10  ;;  %v270_v17 = vsel %vm149_vm0, %v61_v14, 0.0 }
  0x52   :  { %v733_v21 = vadd.s32 4294967288, %v2039_v15 }
  0x53   :  { %406 = vadd.xlane.f32.xlu1 %v405_v18  ;;  %v2043_v18 = vshrl.u32 %v727_v10, 7  ;;  %v465_v10 = vsel %vm149_vm0, %v126_v5, 0.0 }
  0x54   :  { %355 = vadd.xlane.f32.xlu0 %v354_v19  ;;  %v110_v19 = vld [vmem:[%s2928_s0 + $0x2c8] sm:$0xff] }
  0x55   :  { %v417_v24 = vsel %vm149_vm0, %v110_v19, 0.0 }
  0x57   :  { %502 = vadd.xlane.f32.xlu1 %v501_v22 }
  0x58   :  { %451 = vadd.xlane.f32.xlu0 %v450_v23 }
  0x5b   :  { %217 = vadd.xlane.f32.xlu1 %v216_v26  ;;  %v2056_v26 = vsub.s32 %v2039_v15, %v2043_v18 }
  0x5c   :  { %166 = vadd.xlane.f32.xlu0 %v165_v27  ;;  %v2059_v27 = vsub.s32 %v733_v21, %v2043_v18 }
  0x5f   :  { %313 = vadd.xlane.f32.xlu1 %v312_v30 }
  0x60   :  { %262 = vadd.xlane.f32.xlu0 %v261_v31 }
  0x63   :  { %409 = vadd.xlane.f32.xlu1 %v408_v34 }
  0x64   :  { %358 = vadd.xlane.f32.xlu0 %v357_v35 }
  0x67   :  { %505 = vadd.xlane.f32.xlu1 %v504_v38  ;;  %v47_v38 = vld [vmem:[%s2928_s0 + $0xd0] sm:$0xff] }
  0x68   :  { %454 = vadd.xlane.f32.xlu0 %v453_v39  ;;  %v30_v39 = vld [vmem:[%s2928_s0 + $0x48] sm:$0xff]  ;;  %v228_v44 = vsel %vm149_vm0, %v47_v38, 0.0 }
  0x69   :  { %v177_v45 = vsel %vm149_vm0, %v30_v39, 0.0 }
  0x6b   :  { %220 = vadd.xlane.f32.xlu1 %v219_v42 }
  0x6c   :  { %169 = vadd.xlane.f32.xlu0 %v168_v43 }
  0x6f   :  { %316 = vadd.xlane.f32.xlu1 %v315_v46 }
  0x70   :  { %265 = vadd.xlane.f32.xlu0 %v264_v47 }
  0x73   :  { %412 = vadd.xlane.f32.xlu1 %v411_v50 }
  0x74   :  { %361 = vadd.xlane.f32.xlu0 %v360_v51 }
  0x77   :  { %508 = vadd.xlane.f32.xlu1 %v507_v54  ;;  %v273_v54 = vsel %vm149_vm0, %v62_v49, 0.0 }
  0x78   :  { %457 = vadd.xlane.f32.xlu0 %v456_v55 }
  0x7b   :  { %223 = vadd.xlane.f32.xlu1 %v222_v58  ;;  %v94_v58 = vld [vmem:[%s2928_s0 + $0x248] sm:$0xff] }
  0x7c   :  { %172 = vadd.xlane.f32.xlu0 %v171_v59  ;;  %v740_v59 = vadd.s32 4294967280, %v2039_v15  ;;  %v369_v0 = vsel %vm149_vm0, %v94_v58, 0.0 }
  0x7f   :  { %319 = vadd.xlane.f32.xlu1 %v318_v62 }
  0x80   :  { %268 = vadd.xlane.f32.xlu0 %v267_v63  ;;  %v420_v63 = vsel %vm149_vm0, %v111_v57, 0.0  ;;  %v32_v57 = vld [vmem:[%s2928_s0 + $0x58] sm:$0xff] }
  0x83   :  { %415 = vadd.xlane.f32.xlu1 %v414_v2 }
  0x84   :  { %364 = vadd.xlane.f32.xlu0 %v363_v3  ;;  %v2113_v3 = vsub.s32 %v740_v59, %v2043_v18 }
  0x87   :  { %511 = vadd.xlane.f32.xlu1 %v510_v6 }
  0x88   :  { %460 = vadd.xlane.f32.xlu0 %v459_v7 }
  0x8b   :  { %226 = vadd.xlane.f32.xlu1 %v225_v11 }
  0x8c   :  { %175 = vadd.xlane.f32.xlu0 %v174_v12  ;;  %v48_v12 = vld [vmem:[%s2928_s0 + $0xd8] sm:$0xff] }
  0x8d   :  { %v231_v19 = vsel %vm149_vm0, %v48_v12, 0.0  ;;  %v113_v12 = vld [vmem:[%s2928_s0 + $0x2e0] sm:$0xff] }
  0x8f   :  { %322 = vadd.xlane.f32.xlu1 %v321_v16 }
  0x90   :  { %271 = vadd.xlane.f32.xlu0 %v270_v17  ;;  %v296_v22 = vpop.xlane.xlu1 %295 }
  0x91   :  { %v200_v23 = vpop.xlane.xlu0 %199  ;;  %v999_v34 = vrot.slane %v296_v22, %v2056_v26 }
  0x92   :  { %v841_v35 = vrot.slane %v200_v23, %v2056_v26 }
  0x93   :  { %418 = vadd.xlane.f32.xlu1 %v417_v24  ;;  %v80_v24 = vld [vmem:[%s2928_s0 + $0x1d8] sm:$0xff] }
  0x94   :  { %367 = vadd.xlane.f32.xlu0 %v366_v25  ;;  %v299_v30 = vpop.xlane.xlu1 %298  ;;  %v63_v25 = vld [vmem:[%s2928_s0 + $0x150] sm:$0xff] }
  0x95   :  { %v203_v31 = vpop.xlane.xlu0 %202  ;;  %v1003_v36 = vrot.slane %v299_v30, %v2059_v27 }
  0x96   :  { %v845_v37 = vrot.slane %v203_v31, %v2059_v27 }
  0x97   :  { %v1004_v40 = vsel %vm738_vm1, %v1003_v36, %v999_v34  ;;  %514 = vadd.xlane.f32.xlu1 %v513_v32  ;;  %v327_v32 = vsel %vm149_vm0, %v80_v24, 0.0  ;;  %v112_v36 = vld [vmem:[%s2928_s0 + $0x2d8] sm:$0xff] }
  0x98   :  { %v846_v41 = vsel %vm738_vm1, %v845_v37, %v841_v35  ;;  %463 = vadd.xlane.f32.xlu0 %v462_v33  ;;  %v395_v42 = vpop.xlane.xlu1 %394  ;;  %v276_v33 = vsel %vm149_vm0, %v63_v25, 0.0  ;;  %v95_v37 = vld [vmem:[%s2928_s0 + $0x250] sm:$0xff]  ;;  %v128_v24 = vld [vmem:[%s2928_s0 + $0x358] sm:$0xff]  ;;  %v754_v25 = vadd.s32 4294967264, %v2039_v15 }
  0x99   :  { %v392_v43 = vpop.xlane.xlu0 %391  ;;  %v1161_v46 = vrot.slane %v395_v42, %v2059_v27  ;;  %v372_v42 = vsel %vm149_vm0, %v95_v37, 0.0  ;;  %v50_v37 = vld [vmem:[%s2928_s0 + $0xe8] sm:$0xff] }
  0x9a   :  { %v1157_v47 = vrot.slane %v392_v43, %v2056_v26 }
  0x9b   :  { %229 = vadd.xlane.f32.xlu1 %v228_v44  ;;  %v144_v44 = vld [vmem:[%s2928_s0 + $0x3d8] sm:$0xff] }
  0x9c   :  { %v2092_v50 = vsel %vm738_vm1, %v1161_v46, %v1157_v47  ;;  %178 = vadd.xlane.f32.xlu0 %v177_v45  ;;  %v491_v51 = vpop.xlane.xlu1 %490  ;;  %v127_v45 = vld [vmem:[%s2928_s0 + $0x350] sm:$0xff]  ;;  %v747_v46 = vadd.s32 4294967272, %v2039_v15 }
  0x9d   :  { %v488_v52 = vpop.xlane.xlu0 %487  ;;  %v1319_v55 = vrot.slane %v491_v51, %v2059_v27  ;;  %v519_v51 = vsel %vm149_vm0, %v144_v44, 0.0 }
  0x9e   :  { %v1315_v56 = vrot.slane %v488_v52, %v2056_v26  ;;  %v468_v52 = vsel %vm149_vm0, %v127_v45, 0.0 }
  0x9f   :  { %325 = vadd.xlane.f32.xlu1 %v324_v53 }
  0xa0   :  { %v2106_v60 = vsel %vm738_vm1, %v1319_v55, %v1315_v56  ;;  %274 = vadd.xlane.f32.xlu0 %v273_v54  ;;  %v155_v61 = vpop.xlane.xlu1 %154  ;;  %v2178_v56 = vsub.s32 %v747_v46, %v2043_v18  ;;  %v82_v46 = vld [vmem:[%s2928_s0 + $0x1e8] sm:$0xff] }
  0xa1   :  { %v152_v62 = vpop.xlane.xlu0 %151  ;;  %v737_v1 = vrot.slane %v155_v61, %v2059_v27 }
  0xa2   :  { %v732_v2 = vrot.slane %v152_v62, %v2056_v26  ;;  %v183_v62 = vsel %vm149_vm0, %v32_v57, 0.0  ;;  %v114_v57 = vld [vmem:[%s2928_s0 + $0x2e8] sm:$0xff] }
  0xa3   :  { %421 = vadd.xlane.f32.xlu1 %v420_v63 }
  0xa4   :  { %v2122_v6 = vsel %vm738_vm1, %v737_v1, %v732_v2  ;;  %370 = vadd.xlane.f32.xlu0 %v369_v0  ;;  %v248_v7 = vpop.xlane.xlu1 %247  ;;  %v81_v1 = vld [vmem:[%s2928_s0 + $0x1e0] sm:$0xff] }
  0xa5   :  { %v206_v8 = vpop.xlane.xlu0 %205  ;;  %v920_v21 = vrot.slane %v248_v7, %v2056_v26 }
  0xa6   :  { %v850_v11 = vrot.slane %v206_v8, %v2113_v3  ;;  %v330_v8 = vsel %vm149_vm0, %v81_v1, 0.0 }
  0xa7   :  { %517 = vadd.xlane.f32.xlu1 %v516_v9 }
  0xa8   :  { %v851_v14 = vsel %vm745_vm2, %v850_v11, %v846_v41  ;;  %466 = vadd.xlane.f32.xlu0 %v465_v10  ;;  %v302_v16 = vpop.xlane.xlu1 %301  ;;  %v423_v41 = vsel %vm149_vm0, %v112_v36, 0.0  ;;  %v2233_v36 = vsub.s32 %v754_v25, %v2043_v18  ;;  %v83_v25 = vld [vmem:[%s2928_s0 + $0x1f0] sm:$0xff] }
  0xa9   :  { %v251_v17 = vpop.xlane.xlu0 %250  ;;  %v1008_v22 = vrot.slane %v302_v16, %v2113_v3 }
  0xaa   :  { %v924_v23 = vrot.slane %v251_v17, %v2059_v27 }
  0xab   :  { %v1009_v28 = vsel %vm745_vm2, %v1008_v22, %v1004_v40  ;;  %232 = vadd.xlane.f32.xlu1 %v231_v19  ;;  %v426_v19 = vsel %vm149_vm0, %v113_v12, 0.0 }
  0xac   :  { %v925_v29 = vsel %vm738_vm1, %v924_v23, %v920_v21  ;;  %181 = vadd.xlane.f32.xlu0 %v180_v20  ;;  %v347_v30 = vpop.xlane.xlu1 %346  ;;  %v145_v23 = vld [vmem:[%s2928_s0 + $0x3e0] sm:$0xff] }
  0xad   :  { %v344_v31 = vpop.xlane.xlu0 %343  ;;  %v1082_v34 = vrot.slane %v347_v30, %v2059_v27 }
  0xae   :  { %v1078_v35 = vrot.slane %v344_v31, %v2056_v26 }
  0xaf   :  { %328 = vadd.xlane.f32.xlu1 %v327_v32  ;;  %v522_v32 = vsel %vm149_vm0, %v145_v23, 0.0 }
  0xb0   :  { %v2158_v38 = vsel %vm738_vm1, %v1082_v34, %v1078_v35  ;;  %277 = vadd.xlane.f32.xlu0 %v276_v33  ;;  %v440_v39 = vpop.xlane.xlu1 %439  ;;  %v471_v33 = vsel %vm149_vm0, %v128_v24, 0.0 }
  0xb1   :  { %v398_v40 = vpop.xlane.xlu0 %397  ;;  %v1236_v53 = vrot.slane %v440_v39, %v2056_v26 }
  0xb2   :  { %v1166_v43 = vrot.slane %v398_v40, %v2113_v3 }
  0xb3   :  { %424 = vadd.xlane.f32.xlu1 %v423_v41 }
  0xb4   :  { %v1167_v47 = vsel %vm745_vm2, %v1166_v43, %v2092_v50  ;;  %373 = vadd.xlane.f32.xlu0 %v372_v42  ;;  %v494_v48 = vpop.xlane.xlu1 %493  ;;  %v49_v50 = vld [vmem:[%s2928_s0 + $0xe0] sm:$0xff]  ;;  %v237_v42 = vsel %vm149_vm0, %v50_v37, 0.0 }
  0xb5   :  { %v443_v49 = vpop.xlane.xlu0 %442  ;;  %v1324_v54 = vrot.slane %v494_v48, %v2113_v3  ;;  %v234_v61 = vsel %vm149_vm0, %v49_v50, 0.0 }
  0xb6   :  { %v1240_v55 = vrot.slane %v443_v49, %v2059_v27 }
  0xb7   :  { %v1325_v58 = vsel %vm745_vm2, %v1324_v54, %v2106_v60  ;;  %520 = vadd.xlane.f32.xlu1 %v519_v51  ;;  %v64_v60 = vld [vmem:[%s2928_s0 + $0x158] sm:$0xff] }
  0xb8   :  { %v1241_v26 = vsel %vm738_vm1, %v1240_v55, %v1236_v53  ;;  %469 = vadd.xlane.f32.xlu0 %v468_v52  ;;  %v209_v27 = vpop.xlane.xlu1 %208  ;;  %v279_v9 = vsel %vm149_vm0, %v64_v60, 0.0  ;;  %v333_v53 = vsel %vm149_vm0, %v82_v46, 0.0  ;;  %v146_v60 = vld [vmem:[%s2928_s0 + $0x3e8] sm:$0xff]  ;;  %vm19_vm1 = vcmask 25600  }
  0xb9   :  { %v158_v59 = vpop.xlane.xlu0 %157  ;;  %v855_v63 = vrot.slane %v209_v27, %v2178_v56 }
  0xba   :  { %v744_v0 = vrot.slane %v158_v59, %v2113_v3 }
  0xbb   :  { %v856_v2 = vsel %vm752_vm3, %v855_v63, %v851_v14  ;;  %235 = vadd.xlane.f32.xlu1 %v234_v61 }
  0xbc   :  { %v746_v4 = vsel %vm745_vm2, %v744_v0, %v2122_v6  ;;  %184 = vadd.xlane.f32.xlu0 %v183_v62  ;;  %v305_v5 = vpop.xlane.xlu1 %304  ;;  %v96_v6 = vld [vmem:[%s2928_s0 + $0x258] sm:$0xff]  ;;  %v429_v62 = vsel %vm149_vm0, %v114_v57, 0.0 }
  0xbd   :  { %v254_v7 = vpop.xlane.xlu0 %253  ;;  %v1013_v10 = vrot.slane %v305_v5, %v2178_v56  ;;  %v375_v20 = vsel %vm149_vm0, %v96_v6, 0.0 }
  0xbe   :  { %v929_v11 = vrot.slane %v254_v7, %v2113_v3 }
  0xbf   :  { %v1014_v13 = vsel %vm752_vm3, %v1013_v10, %v1009_v28  ;;  %331 = vadd.xlane.f32.xlu1 %v330_v8  ;;  %v525_v10 = vsel %vm149_vm0, %v146_v60, 0.0 }
  0xc0   :  { %v930_v14 = vsel %vm745_vm2, %v929_v11, %v925_v29  ;;  %280 = vadd.xlane.f32.xlu0 %v279_v9  ;;  %v401_v16 = vpop.xlane.xlu1 %400 }
  0xc1   :  { %v350_v17 = vpop.xlane.xlu0 %349  ;;  %v1171_v21 = vrot.slane %v401_v16, %v2178_v56  ;;  %v34_v16 = vld [vmem:[%s2928_s0 + $0x68] sm:$0xff] }
  0xc2   :  { %v1087_v22 = vrot.slane %v350_v17, %v2113_v3 }
  0xc3   :  { %v1172_v28 = vsel %vm752_vm3, %v1171_v21, %v1167_v47  ;;  %427 = vadd.xlane.f32.xlu1 %v426_v19  ;;  %v65_v47 = vld [vmem:[%s2928_s0 + $0x160] sm:$0xff] }
  0xc4   :  { %v1088_v29 = vsel %vm745_vm2, %v1087_v22, %v2158_v38  ;;  %376 = vadd.xlane.f32.xlu0 %v375_v20  ;;  %v497_v30 = vpop.xlane.xlu1 %496  ;;  %v33_v38 = vld [vmem:[%s2928_s0 + $0x60] sm:$0xff]  ;;  %v282_v54 = vsel %vm149_vm0, %v65_v47, 0.0  ;;  %v189_v22 = vsel %vm149_vm0, %v34_v16, 0.0  ;;  %v147_v47 = vld [vmem:[%s2928_s0 + $0x3f0] sm:$0xff]  ;;  %v116_v16 = vld [vmem:[%s2928_s0 + $0x2f8] sm:$0xff] }
  0xc5   :  { %v446_v31 = vpop.xlane.xlu0 %445  ;;  %v1329_v34 = vrot.slane %v497_v30, %v2178_v56  ;;  %v186_v43 = vsel %vm149_vm0, %v33_v38, 0.0  ;;  %v115_v38 = vld [vmem:[%s2928_s0 + $0x2f0] sm:$0xff] }
  0xc6   :  { %v1245_v35 = vrot.slane %v446_v31, %v2113_v3 }
  0xc7   :  { %v1330_v39 = vsel %vm752_vm3, %v1329_v34, %v1325_v58  ;;  %523 = vadd.xlane.f32.xlu1 %v522_v32  ;;  %v97_v58 = vld [vmem:[%s2928_s0 + $0x260] sm:$0xff] }
  0xc8   :  { %v1246_v40 = vsel %vm745_vm2, %v1245_v35, %v1241_v26  ;;  %472 = vadd.xlane.f32.xlu0 %v471_v33  ;;  %v212_v41 = vpop.xlane.xlu1 %211  ;;  %v378_v63 = vsel %vm149_vm0, %v97_v58, 0.0  ;;  %v336_v33 = vsel %vm149_vm0, %v83_v25, 0.0  ;;  %v535_v25 = vld [vmem:[%s2929_s1] sm:$0xff] }
  0xc9   :  { %v161_v3 = vpop.xlane.xlu0 %160  ;;  %v860_v44 = vrot.slane %v212_v41, %v2233_v36 }
  0xca   :  { %v751_v45 = vrot.slane %v161_v3, %v2178_v56 }
  0xcb   :  { %v861_v48 = vsel %vm759_vm4, %v860_v44, %v856_v2  ;;  %238 = vadd.xlane.f32.xlu1 %v237_v42  ;;  %v129_v2 = vld [vmem:[%s2928_s0 + $0x360] sm:$0xff] }
  0xcc   :  { %v753_v49 = vsel %vm752_vm3, %v751_v45, %v746_v4  ;;  %187 = vadd.xlane.f32.xlu0 %v186_v43  ;;  %v308_v51 = vpop.xlane.xlu1 %307  ;;  %v761_v4 = vadd.s32 4294967256, %v2039_v15  ;;  %v474_v11 = vsel %vm149_vm0, %v129_v2, 0.0  ;;  %v432_v43 = vsel %vm149_vm0, %v115_v38, 0.0 }
  0xcd   :  { %v257_v52 = vpop.xlane.xlu0 %256  ;;  %v1018_v55 = vrot.slane %v308_v51, %v2233_v36 }
  0xce   :  { %v934_v50 = vrot.slane %v257_v52, %v2178_v56 }
  0xcf   :  { %v1019_v26 = vsel %vm759_vm4, %v1018_v55, %v1014_v13  ;;  %334 = vadd.xlane.f32.xlu1 %v333_v53  ;;  %v2285_v13 = vsub.s32 %v761_v4, %v2043_v18  ;;  %v528_v55 = vsel %vm149_vm0, %v147_v47, 0.0  ;;  %v84_v4 = vld [vmem:[%s2928_s0 + $0x1f8] sm:$0xff] }
  0xd0   :  { %v935_v27 = vsel %vm752_vm3, %v934_v50, %v930_v14  ;;  %283 = vadd.xlane.f32.xlu0 %v282_v54  ;;  %v404_v59 = vpop.xlane.xlu1 %403  ;;  %v51_v14 = vld [vmem:[%s2928_s0 + $0xf0] sm:$0xff] }
  0xd1   :  { %v353_v61 = vpop.xlane.xlu0 %352  ;;  %v1176_v0 = vrot.slane %v404_v59, %v2233_v36  ;;  %v240_v21 = vsel %vm149_vm0, %v51_v14, 0.0  ;;  %v35_v59 = vld [vmem:[%s2928_s0 + $0x70] sm:$0xff] }
  0xd2   :  { %v1092_v1 = vrot.slane %v353_v61, %v2178_v56 }
  0xd3   :  { %v1177_v5 = vsel %vm759_vm4, %v1176_v0, %v1172_v28  ;;  %430 = vadd.xlane.f32.xlu1 %v429_v62  ;;  %v66_v28 = vld [vmem:[%s2928_s0 + $0x168] sm:$0xff] }
  0xd4   :  { %v1093_v7 = vsel %vm752_vm3, %v1092_v1, %v1088_v29  ;;  %379 = vadd.xlane.f32.xlu0 %v378_v63  ;;  %v500_v8 = vpop.xlane.xlu1 %499  ;;  %v285_v34 = vsel %vm149_vm0, %v66_v28, 0.0  ;;  %v192_v1 = vsel %vm149_vm0, %v35_v59, 0.0  ;;  %v536_v28 = vld [vmem:[%s2929_s1 + $0x8] sm:$0xff]  ;;  %v569_v59 = vld [vmem:[%s2929_s1 + $0x110] sm:$0xff] }
  0xd5   :  { %v449_v9 = vpop.xlane.xlu0 %448  ;;  %v1334_v12 = vrot.slane %v500_v8, %v2233_v36 }
  0xd6   :  { %v1250_v6 = vrot.slane %v449_v9, %v2178_v56 }
  0xd7   :  { %v1335_v17 = vsel %vm759_vm4, %v1334_v12, %v1330_v39  ;;  %526 = vadd.xlane.f32.xlu1 %v525_v10  ;;  %v98_v39 = vld [vmem:[%s2928_s0 + $0x268] sm:$0xff] }
  0xd8   :  { %v1251_v19 = vsel %vm752_vm3, %v1250_v6, %v1246_v40  ;;  %475 = vadd.xlane.f32.xlu0 %v474_v11  ;;  %v215_v20 = vpop.xlane.xlu1 %214  ;;  %v381_v44 = vsel %vm149_vm0, %v98_v39, 0.0  ;;  %v339_v11 = vsel %vm149_vm0, %v84_v4, 0.0  ;;  %v555_v4 = vld [vmem:[%s2929_s1 + $0xa0] sm:$0xff] }
  0xd9   :  { %v164_v56 = vpop.xlane.xlu0 %163  ;;  %v865_v23 = vrot.slane %v215_v20, %v2285_v13  ;;  %v552_v20 = vld [vmem:[%s2929_s1 + $0x88] sm:$0xff] }
  0xda   :  { %v758_v24 = vrot.slane %v164_v56, %v2233_v36  ;;  %v583_v56 = vld [vmem:[%s2929_s1 + $0x180] sm:$0xff] }
  0xdb   :  { %v866_v29 = vsel %vm766_vm5, %v865_v23, %v861_v48  ;;  %241 = vadd.xlane.f32.xlu1 %v240_v21  ;;  %v130_v48 = vld [vmem:[%s2928_s0 + $0x368] sm:$0xff] }
  0xdc   :  { %v760_v30 = vsel %vm759_vm4, %v758_v24, %v753_v49  ;;  %190 = vadd.xlane.f32.xlu0 %v189_v22  ;;  %v311_v31 = vpop.xlane.xlu1 %310  ;;  %v768_v49 = vadd.s32 4294967248, %v2039_v15  ;;  %v477_v50 = vsel %vm149_vm0, %v130_v48, 0.0  ;;  %v584_v24 = vld [vmem:[%s2929_s1 + $0x188] sm:$0xff] }
  0xdd   :  { %v260_v32 = vpop.xlane.xlu0 %259  ;;  %v1023_v35 = vrot.slane %v311_v31, %v2285_v13  ;;  %v435_v31 = vsel %vm149_vm0, %v116_v16, 0.0 }
  0xde   :  { %v939_v37 = vrot.slane %v260_v32, %v2233_v36 }
  0xdf   :  { %v1024_v40 = vsel %vm766_vm5, %v1023_v35, %v1019_v26  ;;  %337 = vadd.xlane.f32.xlu1 %v336_v33  ;;  %v2341_v26 = vsub.s32 %v768_v49, %v2043_v18  ;;  %v1673_v33 = vpack.c.bf16 %v584_v24, %v583_v56  ;;  %v567_v35 = vld [vmem:[%s2929_s1 + $0x100] sm:$0xff]  ;;  %v586_v49 = vld [vmem:[%s2929_s1 + $0x198] sm:$0xff] }
  0xe0   :  { %v940_v41 = vsel %vm759_vm4, %v939_v37, %v935_v27  ;;  %286 = vadd.xlane.f32.xlu0 %v285_v34  ;;  %v407_v3 = vpop.xlane.xlu1 %406  ;;  %v52_v27 = vld [vmem:[%s2928_s0 + $0xf8] sm:$0xff]  ;;  %v1643_v34 = vpack.c.bf16 %v536_v28, %v535_v25  ;;  %v568_v37 = vld [vmem:[%s2929_s1 + $0x108] sm:$0xff]  ;;  %v571_v56 = vld [vmem:[%s2929_s1 + $0x120] sm:$0xff] }
  0xe1   :  { %v356_v42 = vpop.xlane.xlu0 %355  ;;  %v1181_v45 = vrot.slane %v407_v3, %v2285_v13  ;;  %v243_v0 = vsel %vm149_vm0, %v52_v27, 0.0  ;;  %v775_v3 = vadd.s32 4294967240, %v2039_v15  ;;  %1674 = vmatprep.subr.bf16.mxu1 %v1673_v33  ;;  %v132_v28 = vld [vmem:[%s2928_s0 + $0x378] sm:$0xff]  ;;  %v589_v33 = vld [vmem:[%s2929_s1 + $0x1b0] sm:$0xff] }
  0xe2   :  { %v1097_v46 = vrot.slane %v356_v42, %v2233_v36  ;;  %v1675_v42 = vpack.c.bf16 %v568_v37, %v567_v35 }
  0xe3   :  { %v2331_v51 = vsel %vm766_vm5, %v1181_v45, %v1177_v5  ;;  %433 = vadd.xlane.f32.xlu1 %v432_v43  ;;  %v67_v5 = vld [vmem:[%s2928_s0 + $0x170] sm:$0xff] }
  0xe4   :  { %v2334_v52 = vsel %vm759_vm4, %v1097_v46, %v1093_v7  ;;  %382 = vadd.xlane.f32.xlu0 %v381_v44  ;;  %v503_v53 = vpop.xlane.xlu1 %502  ;;  %v288_v12 = vsel %vm149_vm0, %v67_v5, 0.0  ;;  %v553_v43 = vld [vmem:[%s2929_s1 + $0x90] sm:$0xff]  ;;  %v554_v44 = vld [vmem:[%s2929_s1 + $0x98] sm:$0xff]  ;;  %1676 = vmatpush3.bf16.msra.mxu1 %v1675_v42  ;;  %v556_v5 = vld [vmem:[%s2929_s1 + $0xa8] sm:$0xff] }
  0xe5   :  { %v452_v54 = vpop.xlane.xlu0 %451  ;;  %v1339_v57 = vrot.slane %v503_v53, %v2285_v13  ;;  %v585_v45 = vld [vmem:[%s2929_s1 + $0x190] sm:$0xff]  ;;  %v1645_v48 = vpack.c.bf16 %v554_v44, %v553_v43 }
  0xe6   :  { %v1255_v58 = vrot.slane %v452_v54, %v2233_v36  ;;  %v537_v53 = vld [vmem:[%s2929_s1 + $0x10] sm:$0xff] }
  0xe7   :  { %v2350_v61 = vsel %vm766_vm5, %v1339_v57, %v1335_v17  ;;  %529 = vadd.xlane.f32.xlu1 %v528_v55  ;;  %v99_v17 = vld [vmem:[%s2928_s0 + $0x270] sm:$0xff]  ;;  %v68_v57 = vld [vmem:[%s2928_s0 + $0x178] sm:$0xff] }
  0xe8   :  { %v2353_v62 = vsel %vm759_vm4, %v1255_v58, %v1251_v19  ;;  %478 = vadd.xlane.f32.xlu0 %v477_v50  ;;  %v218_v36 = vpop.xlane.xlu1 %217  ;;  %v551_v19 = vld [vmem:[%s2929_s1 + $0x80] sm:$0xff]  ;;  %v384_v32 = vsel %vm149_vm0, %v99_v17, 0.0  ;;  %v1677_v58 = vpack.c.bf16 %v586_v49, %v585_v45  ;;  %v1649_v17 = vpack.c.bf16 %v556_v5, %v555_v4  ;;  %v573_v44 = vld [vmem:[%s2929_s1 + $0x130] sm:$0xff]  ;;  %v574_v45 = vld [vmem:[%s2929_s1 + $0x138] sm:$0xff] }
  0xe9   :  { %v167_v63 = vpop.xlane.xlu0 %166  ;;  %v870_v60 = vrot.slane %v218_v36, %v2341_v26  ;;  %v1641_v23 = vpack.c.bf16 %v552_v20, %v551_v19  ;;  %v570_v36 = vld [vmem:[%s2929_s1 + $0x118] sm:$0xff]  ;;  %v782_v5 = vadd.s32 4294967232, %v2039_v15 }
  0xea   :  { %v765_v2 = vrot.slane %v167_v63, %v2285_v13  ;;  %1678 = vmatprep.subr.bf16.mxu1 %v1677_v58  ;;  %v592_v58 = vld [vmem:[%s2929_s1 + $0x1c8] sm:$0xff] }
  0xeb   :  { %v2366_v7 = vsel %vm773_vm6, %v870_v60, %v866_v29  ;;  %244 = vadd.xlane.f32.xlu1 %v243_v0  ;;  %1642 = vmatprep.subr.bf16.mxu0 %v1641_v23  ;;  %v36_v60 = vld [vmem:[%s2928_s0 + $0x78] sm:$0xff]  ;;  %v572_v23 = vld [vmem:[%s2929_s1 + $0x128] sm:$0xff] }
  0xec   :  { %v2369_v8 = vsel %vm766_vm5, %v765_v2, %v760_v30  ;;  %193 = vadd.xlane.f32.xlu0 %v192_v1  ;;  %v314_v9 = vpop.xlane.xlu1 %313  ;;  %1644 = vmatpush3.bf16.msra.mxu0 %v1643_v34  ;;  %v2462_v1 = vsub.s32 %v775_v3, %v2043_v18  ;;  %v1679_v2 = vpack.c.bf16 %v570_v36, %v569_v59  ;;  %v195_v16 = vsel %vm149_vm0, %v36_v60, 0.0  ;;  %v576_v60 = vld [vmem:[%s2929_s1 + $0x148] sm:$0xff] }
  0xed   :  { %v263_v10 = vpop.xlane.xlu0 %262  ;;  %v1028_v6 = vrot.slane %v314_v9, %v2341_v26  ;;  %1646 = vmatprep.subr.bf16.mxu0 %v1645_v48 }
  0xee   :  { %v944_v14 = vrot.slane %v263_v10, %v2285_v13  ;;  %1680 = vmatpush3.bf16.msra.mxu1 %v1679_v2 }
  0xef   :  { %v2391_v21 = vsel %vm773_vm6, %v1028_v6, %v1024_v40  ;;  %340 = vadd.xlane.f32.xlu1 %v339_v11  ;;  %v148_v40 = vld [vmem:[%s2928_s0 + $0x3f8] sm:$0xff]  ;;  %v291_v11 = vsel %vm149_vm0, %v68_v57, 0.0  ;;  %v539_v6 = vld [vmem:[%s2929_s1 + $0x20] sm:$0xff] }
  0xf0   :  { %v2394_v22 = vsel %vm766_vm5, %v944_v14, %v940_v41  ;;  %289 = vadd.xlane.f32.xlu0 %v288_v12  ;;  %v410_v29 = vpop.xlane.xlu1 %409  ;;  %v131_v41 = vld [vmem:[%s2928_s0 + $0x370] sm:$0xff]  ;;  %v588_v12 = vld [vmem:[%s2929_s1 + $0x1a8] sm:$0xff] }
  0xf1   :  { %v359_v30 = vpop.xlane.xlu0 %358  ;;  %v1186_v38 = vrot.slane %v410_v29, %v2341_v26  ;;  %v480_v50 = vsel %vm149_vm0, %v131_v41, 0.0  ;;  %v100_v29 = vld [vmem:[%s2928_s0 + $0x278] sm:$0xff] }
  0xf2   :  { %v1102_v39 = vrot.slane %v359_v30, %v2285_v13  ;;  %v1683_v30 = vpack.c.bf16 %v572_v23, %v571_v56  ;;  %v387_v3 = vsel %vm149_vm0, %v100_v29, 0.0  ;;  %v577_v23 = vld [vmem:[%s2929_s1 + $0x150] sm:$0xff]  ;;  %v2615_v29 = vsub.s32 %v782_v5, %v2043_v18 }
  0xf3   :  { %v2433_v46 = vsel %vm773_vm6, %v1186_v38, %v2331_v51  ;;  %436 = vadd.xlane.f32.xlu1 %v435_v31  ;;  %v538_v51 = vld [vmem:[%s2929_s1 + $0x18] sm:$0xff]  ;;  %v557_v31 = vld [vmem:[%s2929_s1 + $0xb0] sm:$0xff] }
  0xf4   :  { %v2437_v47 = vsel %vm766_vm5, %v1102_v39, %v2334_v52  ;;  %385 = vadd.xlane.f32.xlu0 %v384_v32  ;;  %v506_v54 = vpop.xlane.xlu1 %505  ;;  %v531_v52 = vsel %vm149_vm0, %v148_v40, 0.0  ;;  %v1647_v27 = vpack.c.bf16 %v538_v51, %v537_v53  ;;  %v558_v32 = vld [vmem:[%s2929_s1 + $0xb8] sm:$0xff]  ;;  %v541_v39 = vld [vmem:[%s2929_s1 + $0x30] sm:$0xff]  ;;  %v1687_v53 = vpack.c.bf16 %v574_v45, %v573_v44  ;;  %v559_v51 = vld [vmem:[%s2929_s1 + $0xc0] sm:$0xff] }
  0xf5   :  { %v455_v55 = vpop.xlane.xlu0 %454  ;;  %v1344_v63 = vrot.slane %v506_v54, %v2341_v26  ;;  %v1653_v37 = vpack.c.bf16 %v558_v32, %v557_v31  ;;  %v590_v38 = vld [vmem:[%s2929_s1 + $0x1b8] sm:$0xff]  ;;  %v560_v54 = vld [vmem:[%s2929_s1 + $0xc8] sm:$0xff]  ;;  %v563_v31 = vld [vmem:[%s2929_s1 + $0xe0] sm:$0xff] }
  0xf6   :  { %v1260_v0 = vrot.slane %v455_v55, %v2285_v13  ;;  %1648 = vmatpush3.bf16.msra.mxu0 %v1647_v27  ;;  %v587_v13 = vld [vmem:[%s2929_s1 + $0x1a0] sm:$0xff]  ;;  %v1685_v42 = vpack.c.bf16 %v590_v38, %v589_v33  ;;  %v1657_v57 = vpack.c.bf16 %v560_v54, %v559_v51  ;;  %v564_v32 = vld [vmem:[%s2929_s1 + $0xe8] sm:$0xff] }
  0xf7   :  { %v2478_v9 = vsel %vm773_vm6, %v1344_v63, %v2350_v61  ;;  %532 = vadd.xlane.f32.xlu1 %v531_v52  ;;  %v540_v61 = vld [vmem:[%s2929_s1 + $0x28] sm:$0xff]  ;;  %v1681_v19 = vpack.c.bf16 %v588_v12, %v587_v13  ;;  %1650 = vmatprep.subr.bf16.mxu0 %v1649_v17  ;;  %v591_v55 = vld [vmem:[%s2929_s1 + $0x1c0] sm:$0xff]  ;;  %v562_v12 = vld [vmem:[%s2929_s1 + $0xd8] sm:$0xff]  ;;  %v1665_v38 = vpack.c.bf16 %v564_v32, %v563_v31 }
  0xf8   :  { %v2482_v10 = vsel %vm766_vm5, %v1260_v0, %v2353_v62  ;;  %481 = vadd.xlane.f32.xlu0 %v480_v50  ;;  %v221_v14 = vpop.xlane.xlu1 %220  ;;  %v1651_v20 = vpack.c.bf16 %v540_v61, %v539_v6  ;;  %v543_v27 = vld [vmem:[%s2929_s1 + $0x40] sm:$0xff]  ;;  %v593_v6 = vld [vmem:[%s2929_s1 + $0x1d0] sm:$0xff] }
  0xf9   :  { %v170_v62 = vpop.xlane.xlu0 %169  ;;  %v875_v24 = vrot.slane %v221_v14, %v2462_v1  ;;  %1682 = vmatprep.subr.bf16.mxu1 %v1681_v19  ;;  %v575_v0 = vld [vmem:[%s2929_s1 + $0x140] sm:$0xff]  ;;  %v545_v17 = vld [vmem:[%s2929_s1 + $0x50] sm:$0xff]  ;;  %v546_v19 = vld [vmem:[%s2929_s1 + $0x58] sm:$0xff] }
  0xfa   :  { %v772_v25 = vrot.slane %v170_v62, %v2341_v26  ;;  %1652 = vmatpush3.bf16.msra.mxu0 %v1651_v20  ;;  %1684 = vmatpush3.bf16.msra.mxu1 %v1683_v30  ;;  %v1691_v13 = vpack.c.bf16 %v576_v60, %v575_v0  ;;  %v595_v33 = vld [vmem:[%s2929_s1 + $0x1e0] sm:$0xff] }
  0xfb   :  { %v2520_v34 = vsel %vm780_vm7, %v875_v24, %v2366_v7  ;;  %292 = vadd.xlane.f32.xlu1 %v291_v11  ;;  %v542_v7 = vld [vmem:[%s2929_s1 + $0x38] sm:$0xff]  ;;  %1654 = vmatprep.subr.bf16.mxu0 %v1653_v37  ;;  %v561_v11 = vld [vmem:[%s2929_s1 + $0xd0] sm:$0xff] }
  0xfc   :  { %v2524_v35 = vsel %vm773_vm6, %v772_v25, %v2369_v8  ;;  %196 = vadd.xlane.f32.xlu0 %v195_v16  ;;  %v317_v40 = vpop.xlane.xlu1 %316  ;;  %v483_v8 = vsel %vm149_vm0, %v132_v28, 0.0  ;;  %v1655_v43 = vpack.c.bf16 %v542_v7, %v541_v39  ;;  %1686 = vmatprep.subr.bf16.mxu1 %v1685_v42  ;;  %v1661_v62 = vpack.c.bf16 %v562_v12, %v561_v11  ;;  %v594_v16 = vld [vmem:[%s2929_s1 + $0x1d8] sm:$0xff]  ;;  %v596_v39 = vld [vmem:[%s2929_s1 + $0x1e8] sm:$0xff]  ;;  %v547_v7 = vld [vmem:[%s2929_s1 + $0x60] sm:$0xff] }
  0xfd   :  { %v266_v41 = vpop.xlane.xlu0 %265  ;;  %v1033_v48 = vrot.slane %v317_v40, %v2462_v1  ;;  %v1693_v56 = vpack.c.bf16 %v594_v16, %v593_v6  ;;  %v578_v24 = vld [vmem:[%s2929_s1 + $0x158] sm:$0xff]  ;;  %v548_v40 = vld [vmem:[%s2929_s1 + $0x68] sm:$0xff]  ;;  %v789_v6 = vadd.s32 4294967224, %v2039_v15  ;;  %vm1391_vm0 = vcmask 1041409  }
  0xfe   :  { %v949_v49 = vrot.slane %v266_v41, %v2341_v26  ;;  %1656 = vmatpush3.bf16.msra.mxu0 %v1655_v43  ;;  %1688 = vmatpush3.bf16.msra.mxu1 %v1687_v53  ;;  %v1695_v30 = vpack.c.bf16 %v578_v24, %v577_v23  ;;  %v580_v42 = vld [vmem:[%s2929_s1 + $0x168] sm:$0xff]  ;;  %v597_v53 = vld [vmem:[%s2929_s1 + $0x1f0] sm:$0xff] }
  0xff   :  { %v2556_v52 = vsel %vm780_vm7, %v1033_v48, %v2391_v21  ;;  %484 = vadd.xlane.f32.xlu1 %v483_v8  ;;  %v544_v21 = vld [vmem:[%s2929_s1 + $0x48] sm:$0xff]  ;;  %1658 = vmatprep.subr.bf16.mxu0 %v1657_v57  ;;  %v565_v48 = vld [vmem:[%s2929_s1 + $0xf0] sm:$0xff]  ;;  %v598_v57 = vld [vmem:[%s2929_s1 + $0x1f8] sm:$0xff] }
 0x100   :  { %v2560_v50 = vsel %vm773_vm6, %v949_v49, %v2394_v22  ;;  %388 = vadd.xlane.f32.xlu0 %v387_v3  ;;  %v413_v59 = vpop.xlane.xlu1 %412  ;;  %v1689_v22 = vpack.c.bf16 %v592_v58, %v591_v55  ;;  %v1659_v63 = vpack.c.bf16 %v544_v21, %v543_v27  ;;  %v579_v3 = vld [vmem:[%s2929_s1 + $0x160] sm:$0xff]  ;;  %v566_v49 = vld [vmem:[%s2929_s1 + $0xf8] sm:$0xff]  ;;  %v549_v58 = vld [vmem:[%s2929_s1 + $0x70] sm:$0xff] }
 0x101   :  { %v362_v36 = vpop.xlane.xlu0 %361  ;;  %v1191_v2 = vrot.slane %v413_v59, %v2462_v1  ;;  %v1699_v45 = vpack.c.bf16 %v580_v42, %v579_v3  ;;  %v1669_v55 = vpack.c.bf16 %v566_v49, %v565_v48  ;;  %v550_v27 = vld [vmem:[%s2929_s1 + $0x78] sm:$0xff] }
 0x102   :  { %v1107_v4 = vrot.slane %v362_v36, %v2341_v26  ;;  %1690 = vmatprep.subr.bf16.mxu1 %v1689_v22  ;;  %1660 = vmatpush3.bf16.msra.mxu0 %v1659_v63  ;;  %v1671_v36 = vpack.c.bf16 %v550_v27, %v549_v58  ;;  %v582_v22 = vld [vmem:[%s2929_s1 + $0x178] sm:$0xff] }
 0x103   :  { %v2591_v61 = vsel %vm780_vm7, %v1191_v2, %v2433_v46  ;;  %1692 = vmatpush3.bf16.msra.mxu1 %v1691_v13  ;;  %1662 = vmatprep.subr.bf16.mxu0 %v1661_v62 }
 0x104   :  { %v2595_v14 = vsel %vm773_vm6, %v1107_v4, %v2437_v47  ;;  %v509_v20 = vpop.xlane.xlu1 %508  ;;  %v1663_v47 = vpack.c.bf16 %v546_v19, %v545_v17  ;;  %1694 = vmatprep.subr.bf16.mxu1 %v1693_v56 }
 0x105   :  { %v458_v46 = vpop.xlane.xlu0 %457  ;;  %v1349_v25 = vrot.slane %v509_v20, %v2462_v1  ;;  %v792_v20 = vsub.s32 %v789_v6, %v2043_v18 }
 0x106   :  { %v1265_v28 = vrot.slane %v458_v46, %v2341_v26  ;;  %1664 = vmatpush3.bf16.msra.mxu0 %v1663_v47 }
 0x107   :  { %v1350_v26 = vsel %vm780_vm7, %v1349_v25, %v2478_v9  ;;  %1696 = vmatpush3.bf16.msra.mxu1 %v1695_v30  ;;  %v1697_v9 = vpack.c.bf16 %v596_v39, %v595_v33  ;;  %1666 = vmatprep.subr.bf16.mxu0 %v1665_v38 }
 0x108   :  { %v1266_v37 = vsel %vm773_vm6, %v1265_v28, %v2482_v10  ;;  %v224_v41 = vpop.xlane.xlu1 %223  ;;  %v1667_v10 = vpack.c.bf16 %v548_v40, %v547_v7  ;;  %v796_v7 = vadd.s32 4294967216, %v2039_v15 }
 0x109   :  { %v173_v8 = vpop.xlane.xlu0 %172  ;;  %v880_v43 = vrot.slane %v224_v41, %v2615_v29  ;;  %1698 = vmatprep.subr.bf16.mxu1 %v1697_v9 }
 0x10a   :  { %v779_v44 = vrot.slane %v173_v8, %v2462_v1  ;;  %1668 = vmatpush3.bf16.msra.mxu0 %v1667_v10  ;;  %v799_v42 = vsub.s32 %v796_v7, %v2043_v18 }
 0x10b   :  { %v881_v51 = vsel %vm787_vm8, %v880_v43, %v2520_v34  ;;  %1700 = vmatpush3.bf16.msra.mxu1 %v1699_v45  ;;  %v1701_v34 = vpack.c.bf16 %v598_v57, %v597_v53  ;;  %1670 = vmatprep.subr.bf16.mxu0 %v1669_v55 }
 0x10c   :  { %v781_v54 = vsel %vm780_vm7, %v779_v44, %v2524_v35  ;;  %v320_v21 = vpop.xlane.xlu1 %319  ;;  %v581_v35 = vld [vmem:[%s2929_s1 + $0x170] sm:$0xff] }
 0x10d   :  { %v269_v59 = vpop.xlane.xlu0 %268  ;;  %v1038_v63 = vrot.slane %v320_v21, %v2615_v29  ;;  %v1703_v60 = vpack.c.bf16 %v582_v22, %v581_v35  ;;  %1702 = vmatprep.subr.bf16.mxu1 %v1701_v34  ;;  %v803_v22 = vadd.s32 4294967208, %v2039_v15 }
 0x10e   :  { %v954_v0 = vrot.slane %v269_v59, %v2462_v1  ;;  %1672 = vmatpush3.bf16.msra.mxu0 %v1671_v36 }
 0x10f   :  { %v1039_v2 = vsel %vm787_vm8, %v1038_v63, %v2556_v52  ;;  %1704 = vmatpush3.bf16.msra.mxu1 %v1703_v60 }
 0x110   :  { %v955_v4 = vsel %vm780_vm7, %v954_v0, %v2560_v50  ;;  %v416_v5 = vpop.xlane.xlu1 %415 }
 0x111   :  { %v365_v13 = vpop.xlane.xlu0 %364  ;;  %v1196_v11 = vrot.slane %v416_v5, %v2615_v29 }
 0x112   :  { %v1112_v12 = vrot.slane %v365_v13, %v2462_v1  ;;  %v2717_v13 = vsub.s32 %v803_v22, %v2043_v18 }
 0x113   :  { %v1197_v62 = vsel %vm787_vm8, %v1196_v11, %v2591_v61 }
 0x114   :  { %v1113_v16 = vsel %vm780_vm7, %v1112_v12, %v2595_v14  ;;  %v512_v52 = vpop.xlane.xlu1 %511 }
 0x115   :  { %v461_v17 = vpop.xlane.xlu0 %460  ;;  %v1354_v50 = vrot.slane %v512_v52, %v2615_v29 }
 0x116   :  { %v1270_v19 = vrot.slane %v461_v17, %v2462_v1 }
 0x117   :  { %v1355_v46 = vsel %vm787_vm8, %v1354_v50, %v1350_v26 }
 0x118   :  { %v1271_v56 = vsel %vm780_vm7, %v1270_v19, %v1266_v37  ;;  %v227_v47 = vpop.xlane.xlu1 %226 }
 0x119   :  { %v176_v23 = vpop.xlane.xlu0 %175  ;;  %v885_v24 = vrot.slane %v227_v47, %v792_v20 }
 0x11a   :  { %v786_v61 = vrot.slane %v176_v23, %v2615_v29 }
 0x11b   :  { %v886_v14 = vsel %vm794_vm9, %v885_v24, %v881_v51 }
 0x11c   :  { %v788_v25 = vsel %vm787_vm8, %v786_v61, %v781_v54  ;;  %v323_v28 = vpop.xlane.xlu1 %322 }
 0x11d   :  { %v272_v30 = vpop.xlane.xlu0 %271  ;;  %v1043_v31 = vrot.slane %v323_v28, %v792_v20 }
 0x11e   :  { %v959_v1 = vrot.slane %v272_v30, %v2615_v29 }
 0x11f   :  { %v1044_v32 = vsel %vm794_vm9, %v1043_v31, %v1039_v2 }
 0x120   :  { %v960_v33 = vsel %vm787_vm8, %v959_v1, %v955_v4  ;;  %v419_v26 = vpop.xlane.xlu1 %418 }
 0x121   :  { %v368_v37 = vpop.xlane.xlu0 %367  ;;  %v1201_v38 = vrot.slane %v419_v26, %v792_v20 }
 0x122   :  { %v1117_v39 = vrot.slane %v368_v37, %v2615_v29 }
 0x123   :  { %v1202_v40 = vsel %vm794_vm9, %v1201_v38, %v1197_v62 }
 0x124   :  { %v1118_v41 = vsel %vm787_vm8, %v1117_v39, %v1113_v16  ;;  %v515_v8 = vpop.xlane.xlu1 %514 }
 0x125   :  { %v464_v9 = vpop.xlane.xlu0 %463  ;;  %v1359_v10 = vrot.slane %v515_v8, %v792_v20 }
 0x126   :  { %v1275_v3 = vrot.slane %v464_v9, %v2615_v29 }
 0x127   :  { %v1360_v43 = vsel %vm794_vm9, %v1359_v10, %v1355_v46 }
 0x128   :  { %v1276_v44 = vsel %vm787_vm8, %v1275_v3, %v1271_v56  ;;  %v230_v45 = vpop.xlane.xlu1 %229 }
 0x129   :  { %v179_v48 = vpop.xlane.xlu0 %178  ;;  %v890_v49 = vrot.slane %v230_v45, %v799_v42 }
 0x12a   :  { %v793_v53 = vrot.slane %v179_v48, %v792_v20 }
 0x12b   :  { %v891_v51 = vsel %vm801_vm10, %v890_v49, %v886_v14 }
 0x12c   :  { %v795_v54 = vsel %vm794_vm9, %v793_v53, %v788_v25  ;;  %v326_v55 = vpop.xlane.xlu1 %325 }
 0x12d   :  { %v275_v57 = vpop.xlane.xlu0 %274  ;;  %v1048_v58 = vrot.slane %v326_v55, %v799_v42 }
 0x12e   :  { %v964_v27 = vrot.slane %v275_v57, %v792_v20 }
 0x12f   :  { %v1049_v29 = vsel %vm801_vm10, %v1048_v58, %v1044_v32  ;;  %v810_v58 = vadd.s32 4294967200, %v2039_v15 }
 0x130   :  { %v965_v21 = vsel %vm794_vm9, %v964_v27, %v960_v33  ;;  %v422_v59 = vpop.xlane.xlu1 %421  ;;  %v817_v27 = vadd.s32 4294967192, %v2039_v15 }
 0x131   :  { %v371_v34 = vpop.xlane.xlu0 %370  ;;  %v1206_v36 = vrot.slane %v422_v59, %v799_v42  ;;  %v824_v59 = vadd.s32 4294967184, %v2039_v15 }
 0x132   :  { %v1122_v35 = vrot.slane %v371_v34, %v792_v20  ;;  %v2785_v34 = vsub.s32 %v810_v58, %v2043_v18 }
 0x133   :  { %v2713_v63 = vsel %vm801_vm10, %v1206_v36, %v1202_v40  ;;  %v831_v36 = vadd.s32 4294967176, %v2039_v15 }
 0x134   :  { %v1123_v0 = vsel %vm794_vm9, %v1122_v35, %v1118_v41  ;;  %v518_v60 = vpop.xlane.xlu1 %517  ;;  %v2789_v35 = vsub.s32 %v817_v27, %v2043_v18 }
 0x135   :  { %v467_v2 = vpop.xlane.xlu0 %466  ;;  %v1364_v4 = vrot.slane %v518_v60, %v799_v42 }
 0x136   :  { %v1280_v5 = vrot.slane %v467_v2, %v792_v20  ;;  %v2795_v2 = vsub.s32 %v824_v59, %v2043_v18 }
 0x137   :  { %v2720_v11 = vsel %vm801_vm10, %v1364_v4, %v1360_v43 }
 0x138   :  { %v1281_v12 = vsel %vm794_vm9, %v1280_v5, %v1276_v44  ;;  %v233_v6 = vpop.xlane.xlu1 %232  ;;  %v2799_v5 = vsub.s32 %v831_v36, %v2043_v18 }
 0x139   :  { %v182_v62 = vpop.xlane.xlu0 %181  ;;  %v895_v16 = vrot.slane %v233_v6, %v2717_v13 }
 0x13a   :  { %v800_v52 = vrot.slane %v182_v62, %v799_v42 }
 0x13b   :  { %v2725_v17 = vsel %vm808_vm11, %v895_v16, %v891_v51 }
 0x13c   :  { %v802_v50 = vsel %vm801_vm10, %v800_v52, %v795_v54  ;;  %v329_v19 = vpop.xlane.xlu1 %328 }
 0x13d   :  { %v278_v20 = vpop.xlane.xlu0 %277  ;;  %v1053_v46 = vrot.slane %v329_v19, %v2717_v13 }
 0x13e   :  { %v969_v56 = vrot.slane %v278_v20, %v799_v42 }
 0x13f   :  { %v2730_v47 = vsel %vm808_vm11, %v1053_v46, %v1049_v29 }
 0x140   :  { %v2733_v23 = vsel %vm801_vm10, %v969_v56, %v965_v21  ;;  %v425_v24 = vpop.xlane.xlu1 %424 }
 0x141   :  { %v374_v61 = vpop.xlane.xlu0 %373  ;;  %v1211_v60 = vrot.slane %v425_v24, %v2717_v13 }
 0x142   :  { %v1127_v14 = vrot.slane %v374_v61, %v799_v42 }
 0x143   :  { %v1212_v52 = vsel %vm808_vm11, %v1211_v60, %v2713_v63 }
 0x144   :  { %v2736_v25 = vsel %vm801_vm10, %v1127_v14, %v1123_v0  ;;  %v2738_v28 = vpop.xlane.xlu1 %520 }
 0x145   :  { %v470_v30 = vpop.xlane.xlu0 %469  ;;  %v1369_v19 = vrot.slane %v2738_v28, %v2717_v13 }
 0x146   :  { %v1285_v31 = vrot.slane %v470_v30, %v799_v42 }
 0x148   :  { %v2741_v1 = vsel %vm801_vm10, %v1285_v31, %v1281_v12  ;;  %v236_v32 = vpop.xlane.xlu1 %235 }
 0x149   :  { %v185_v33 = vpop.xlane.xlu0 %184  ;;  %v900_v4 = vrot.slane %v236_v32, %v2785_v34 }
 0x14a   :  { %v807_v26 = vrot.slane %v185_v33, %v2717_v13 }
 0x14b   :  { %v901_v20 = vsel %vm815_vm12, %v900_v4, %v2725_v17 }
 0x14c   :  { %v2745_v37 = vsel %vm808_vm11, %v807_v26, %v802_v50  ;;  %v2747_v38 = vpop.xlane.xlu1 %331 }
 0x14d   :  { %v2749_v39 = vpop.xlane.xlu0 %280  ;;  %v1058_v46 = vrot.slane %v2747_v38, %v2785_v34 }
 0x14e   :  { %v974_v24 = vrot.slane %v2749_v39, %v2717_v13 }
 0x150   :  { %v428_v7 = vpop.xlane.xlu1 %427 }
 0x151   :  { %v2751_v40 = vpop.xlane.xlu0 %376  ;;  %v1216_v12 = vrot.slane %v428_v7, %v2785_v34 }
 0x153   :  { %v1217_v63 = vsel %vm815_vm12, %v1216_v12, %v1212_v52 }
 0x154   :  { %v2753_v41 = vpop.xlane.xlu1 %523 }
 0x155   :  { %v2755_v8 = vpop.xlane.xlu0 %472  ;;  %v1374_v61 = vrot.slane %v2753_v41, %v2785_v34  ;;  %v1370_v41 = vsel %vm808_vm11, %v1369_v19, %v2720_v11 }
 0x156   :  { %v1290_v11 = vrot.slane %v2755_v8, %v2717_v13 }
 0x158   :  { %v239_v9 = vpop.xlane.xlu1 %238  ;;  %v1291_v52 = vsel %vm808_vm11, %v1290_v11, %v2741_v1 }
 0x159   :  { %v2757_v10 = vpop.xlane.xlu0 %187  ;;  %v905_v15 = vrot.slane %v239_v9, %v2789_v35 }
 0x15b   :  { %v906_v14 = vsel %vm822_vm13, %v905_v15, %v901_v20 }
 0x15c   :  { %v2759_v3 = vpop.xlane.xlu1 %334 }
 0x15d   :  { %v2761_v42 = vpop.xlane.xlu0 %283  ;;  %v1063_v17 = vrot.slane %v2759_v3, %v2789_v35 }
 0x160   :  { %v431_v43 = vpop.xlane.xlu1 %430 }
 0x161   :  { %v2763_v44 = vpop.xlane.xlu0 %379  ;;  %v1221_v16 = vrot.slane %v431_v43, %v2789_v35 }
 0x162   :  { %v1137_v8 = vrot.slane %v2763_v44, %v2785_v34 }
 0x163   :  { %v1222_v31 = vsel %vm822_vm13, %v1221_v16, %v1217_v63 }
 0x164   :  { %v2765_v45 = vpop.xlane.xlu1 %526 }
 0x165   :  { %v2767_v48 = vpop.xlane.xlu0 %475  ;;  %v1379_v32 = vrot.slane %v2765_v45, %v2789_v35  ;;  %v1059_v45 = vsel %vm815_vm12, %v1058_v46, %v2730_v47  ;;  %v975_v47 = vsel %vm808_vm11, %v974_v24, %v2733_v23 }
 0x166   :  { %v1295_v23 = vrot.slane %v2767_v48, %v2785_v34 }
 0x168   :  { %v242_v49 = vpop.xlane.xlu1 %241 }
 0x169   :  { %v2769_v53 = vpop.xlane.xlu0 %190  ;;  %v910_v50 = vrot.slane %v242_v49, %v2795_v2  ;;  %v1132_v49 = vrot.slane %v2751_v40, %v2717_v13  ;;  %v814_v40 = vrot.slane %v2757_v10, %v2785_v34  ;;  %v979_v13 = vrot.slane %v2761_v42, %v2785_v34 }
 0x16a   :  { %v821_v10 = vrot.slane %v2769_v53, %v2789_v35 }
 0x16b   :  { %v911_v39 = vsel %vm829_vm14, %v910_v50, %v906_v14  ;;  %v1133_v44 = vsel %vm808_vm11, %v1132_v49, %v2736_v25  ;;  %v816_v1 = vsel %vm815_vm12, %v814_v40, %v2745_v37 }
 0x16c   :  { %v2771_v51 = vpop.xlane.xlu1 %337 }
 0x16d   :  { %v2773_v54 = vpop.xlane.xlu0 %286  ;;  %v1068_v26 = vrot.slane %v2771_v51, %v2795_v2  ;;  %v1375_v51 = vsel %vm815_vm12, %v1374_v61, %v1370_v41 }
 0x16e   :  { %v1380_v59 = vsel %vm822_vm13, %v1379_v32, %v1375_v51  ;;  %v984_v15 = vrot.slane %v2773_v54, %v2789_v35  ;;  %v1570_v51 = vld [vmem:[%s2930_s2] ss:$0 sm:$0xff] }
 0x170   :  { %v434_v55 = vpop.xlane.xlu1 %433 }
 0x171   :  { %v2775_v57 = vpop.xlane.xlu0 %382  ;;  %v1226_v18 = vrot.slane %v434_v55, %v2795_v2 }
 0x172   :  { %v1142_v50 = vrot.slane %v2775_v57, %v2789_v35  ;;  %v980_v57 = vsel %vm815_vm12, %v979_v13, %v975_v47 }
 0x173   :  { %v1227_v7 = vsel %vm829_vm14, %v1226_v18, %v1222_v31  ;;  %v985_v19 = vsel %vm822_vm13, %v984_v15, %v980_v57 }
 0x174   :  { %v2779_v29 = vpop.xlane.xlu1 %529 }
 0x175   :  { %v2781_v21 = vpop.xlane.xlu0 %478  ;;  %v1384_v38 = vrot.slane %v2779_v29, %v2795_v2  ;;  %v1064_v29 = vsel %vm822_vm13, %v1063_v17, %v1059_v45 }
 0x176   :  { %v1300_v48 = vrot.slane %v2781_v21, %v2789_v35  ;;  %v1138_v35 = vsel %vm815_vm12, %v1137_v8, %v1133_v44 }
 0x177   :  { %v1385_v60 = vsel %vm829_vm14, %v1384_v38, %v1380_v59 }
 0x178   :  { %v245_v22 = vpop.xlane.xlu1 %244 }
 0x179   :  { %v2791_v0 = vpop.xlane.xlu0 %193  ;;  %v915_v56 = vrot.slane %v245_v22, %v2799_v5  ;;  %v1069_v22 = vsel %vm829_vm14, %v1068_v26, %v1064_v29  ;;  %v1731_v26 = vmov 0.0  }
 0x17a   :  { %v828_v53 = vrot.slane %v2791_v0, %v2795_v2  ;;  %v1296_v0 = vsel %vm815_vm12, %v1295_v23, %v1291_v52  ;;  %20 = vst.msk [vmem:[#allocation2] sm:$0x3] %vm19_vm1, %v1731_v26 }
 0x17b   :  { %v916_v3 = vsel %vm836_vm15, %v915_v56, %v911_v39  ;;  %v1301_v37 = vsel %vm822_vm13, %v1300_v48, %v1296_v0 }
 0x17c   :  { %v341_v6 = vpop.xlane.xlu1 %340 }
 0x17d   :  { %v2803_v62 = vpop.xlane.xlu0 %289  ;;  %v1073_v9 = vrot.slane %v341_v6, %v2799_v5 }
 0x17e   :  { %v989_v54 = vrot.slane %v2803_v62, %v2795_v2  ;;  %v823_v62 = vsel %vm822_vm13, %v821_v10, %v816_v1 }
 0x17f   :  { %v1074_v4 = vsel %vm836_vm15, %v1073_v9, %v1069_v22  ;;  %v830_v63 = vsel %vm829_vm14, %v828_v53, %v823_v62 }
 0x180   :  { %v437_v30 = vpop.xlane.xlu1 %436  ;;  %v990_v61 = vsel %vm829_vm14, %v989_v54, %v985_v19 }
 0x181   :  { %v2823_v28 = vpop.xlane.xlu0 %385  ;;  %v1231_v33 = vrot.slane %v437_v30, %v2799_v5 }
 0x182   :  { %v1147_v34 = vrot.slane %v2823_v28, %v2795_v2 }
 0x183   :  { %v1232_v43 = vsel %vm836_vm15, %v1231_v33, %v1227_v7 }
 0x184   :  { %v533_v55 = vpop.xlane.xlu1 %532  ;;  %v1393_v27 = vsel %vm1391_vm0, %v1232_v43, %v916_v3  ;;  %v534_v43 = vld [vmem:[#allocation2] sm:$0x3] }
 0x185   :  { %v482_v58 = vpop.xlane.xlu0 %481  ;;  %v1389_v36 = vrot.slane %v533_v55, %v2799_v5  ;;  %1464 = vmatprep.mubr.f32.mxu0 %v1393_v27 }
 0x186   :  { %v1305_v25 = vrot.slane %v482_v58, %v2795_v2  ;;  %v1143_v2 = vsel %vm822_vm13, %v1142_v50, %v1138_v35 }
 0x187   :  { %v1390_v12 = vsel %vm836_vm15, %v1389_v36, %v1385_v60  ;;  %v1148_v14 = vsel %vm829_vm14, %v1147_v34, %v1143_v2 }
 0x188   :  { %v293_v6 = vpop.xlane.xlu1 %292  ;;  %v1395_v42 = vsel %vm1391_vm0, %v1390_v12, %v1074_v4  ;;  %v1306_v30 = vsel %vm829_vm14, %v1305_v25, %v1301_v37 }
 0x189   :  { %v197_v16 = vpop.xlane.xlu0 %196  ;;  %1534 = vmatprep.mubr.f32.mxu1 %v1395_v42  ;;  %v994_v18 = vrot.slane %v293_v6, %v2799_v5 }
 0x18a   :  { %v835_v21 = vrot.slane %v197_v16, %v2799_v5 }
 0x18b   :  { %v995_v31 = vsel %vm836_vm15, %v994_v18, %v990_v61 }
 0x18c   :  { %v485_v20 = vpop.xlane.xlu1 %484  ;;  %v837_v28 = vsel %vm836_vm15, %v835_v21, %v830_v63 }
 0x18d   :  { %v389_v46 = vpop.xlane.xlu0 %388  ;;  %v1310_v56 = vrot.slane %v485_v20, %v2799_v5 }
 0x18e   :  { %v1152_v24 = vrot.slane %v389_v46, %v2799_v5 }
 0x18f   :  { %v1311_v32 = vsel %vm836_vm15, %v1310_v56, %v1306_v30 }
 0x190   :  { %v1153_v17 = vsel %vm836_vm15, %v1152_v24, %v1148_v14  ;;  %v1394_v5 = vsel %vm1391_vm0, %v1311_v32, %v995_v31 }
 0x191   :  { %v1392_v33 = vsel %vm1391_vm0, %v1153_v17, %v837_v28  ;;  %1535 = vmatmul.mubr.f32.vlgmr.msra.gmra.mrb[0].mxu1 %v1394_v5 }
 0x192   :  { %1465 = vmatmul.mubr.f32.vlgmr.msra.gmra.mrb[0].mxu0 %v1392_v33 }
 0x264   :  { %v1638_v39 = vpop.f32.mrb[0].mxu1 }
 0x265   :  { %v1603_v38 = vpop.f32.mrb[0].mxu0  ;;  %v1639_v41 = vpop.f32.mrb[1].mxu1 }
 0x266   :  { %v1604_v7 = vpop.f32.mrb[1].mxu0  ;;  %v1640_v3 = vadd.f32 %v1639_v41, %v1638_v39 }
 0x267   :  { %v1605_v9 = vadd.f32 %v1604_v7, %v1603_v38 }
 0x269   :  { %v1537_v45 = vadd.f32 %v1640_v3, %v1605_v9 }
 0x26b   :  { %v1540_v49 = vadd.f32 %v1537_v45, %v534_v43 }
 0x26d   :  { %1542 = vst.msk [vmem:[#allocation2] sm:$0x3] %vm19_vm1, %v1540_v49 }
 0x274   :  { %v1546_v55 = vld [vmem:[#allocation2] sm:$0x3] }
 0x275   :  { %v1554_v58 = vadd.f32 %v1570_v51, %v1546_v55 }
 0x277   :  { %1555 = vst.msk [vmem:[#allocation3] sm:$0x3] %vm19_vm1, %v1554_v58 }
 0x278   :  { %1718 = shalt.err (!%p1715_p4)
}
 0x279   :  { %s1719_s21 = scalar_lea.hbm %s2931_s3, 32 }
 0x27a   :  { %p1720_p5 = scmp.ne.s32.totalorder %s2931_s3, %s1719_s21  ;;  %p1723_p6 = scmp.lt.u32.totalorder %s1719_s21, %s2931_s3 }
 0x27c   :  { %p1725_p7 = pnand %p1723_p6, %p1720_p5 }
 0x27e   :  { %1728 = shalt.err (!%p1725_p7)
}
 0x27f   :  { %1565 = dma.vmem_to_hbm [thread:$0]  %s1563_s17, 32, %s2931_s3, [#allocation4]  }
 0x280   :  { %1729 = dma.done.wait [#allocation4], 32  }
 0x281   :  { %1730 = vsyncadd [#allocation4], 4294967264 }
 0x282   :  { %1569 = vsyncpa [#allocation4], 1 }

</bundles_post_ra>
